<compile_context>
chip_gen: v7x
topology: tpu7x:2x2x1
jax: 0.10.0
libtpu: 0.0.40
codegen_flags: <defaults>
</compile_context>

<pallas_src>
import math
import numpy as np
import jax
import jax.numpy as jnp
from jax import lax
from jax.experimental import pallas as pl
from jax.experimental.pallas import tpu as pltpu

# ---- model / problem sizes (small, consistent with the module) ----
B = 2            # batch
T = 8            # target (decoder) sequence length
S = 8            # source (memory) sequence length
D = 32           # d_model
H = 4            # attention heads
DK = D // H      # per-head dim
DFF = 64         # feed-forward hidden
N_LAYERS = 2     # decoder depth N
EPS = 1e-6       # LayerNorm eps (matches module default)
SCALE = 1.0 / math.sqrt(DK)

BT = B * T       # rows of x with batch folded in
BKV = B * S      # rows of memory with batch folded in
HBK = H * B * T  # block-diagonal score columns (head, batch, key)
LANES = 128      # packed parameter buffer lane width

# The shared structural masks assume equal target/source length (true here).
assert S == T, "packed block-diagonal masks assume S == T"


# --------------------------------------------------------------------------
# Packed parameter buffer layout (one VMEM window, static slices in-kernel)
# --------------------------------------------------------------------------
def _param_layout():
    entries = []
    for li in range(N_LAYERS):
        sfx = str(li)
        entries += [
            ("wqkv" + sfx, (D, 3 * D)), ("bqkv" + sfx, (1, 3 * D)),
            ("wo1" + sfx, (D, D)),      ("bo1" + sfx, (1, D)),
            ("wq2" + sfx, (D, D)),      ("bq2" + sfx, (1, D)),
            ("wkv2" + sfx, (D, 2 * D)), ("bkv2" + sfx, (1, 2 * D)),
            ("wo2" + sfx, (D, D)),      ("bo2" + sfx, (1, D)),
            ("ln1a" + sfx, (1, D)), ("ln1b" + sfx, (1, D)),
            ("ln2a" + sfx, (1, D)), ("ln2b" + sfx, (1, D)),
            ("ln3a" + sfx, (1, D)), ("ln3b" + sfx, (1, D)),
            ("w1" + sfx, (D, DFF)), ("b1" + sfx, (1, DFF)),
            ("w2" + sfx, (DFF, D)), ("b2" + sfx, (1, D)),
        ]
    entries += [
        ("lnfa", (1, D)), ("lnfb", (1, D)),
        # compile-time structural masks for the block-diagonal attention
        ("qmask", (BT, B * D)),
        ("kmaskt", (HBK, B * D)),
        ("vmask", (HBK, D)),
        ("seg", (HBK, HBK)),
    ]
    slots, row = {}, 0
    for name, (r, c) in entries:
        assert c <= LANES
        slots[name] = (row, r, c)
        row += -(-r // 8) * 8          # 8-sublane alignment for clean slices
    return slots, row


SLOTS, PBUF_ROWS = _param_layout()


def _structural_masks():
    # Q': rows (b, t) ; cols (b', h, d')  -> 1 iff b == b'
    qm = np.zeros((BT, B * D), np.float32)
    for b in range(B):
        qm[b * T:(b + 1) * T, b * D:(b + 1) * D] = 1.0
    # K'^T: rows (h', b', s) ; cols (b, h, d') -> 1 iff h == h' and b == b'
    km = np.zeros((HBK, B * D), np.float32)
    for h in range(H):
        for b in range(B):
            r0 = h * B * T + b * T
            km[r0:r0 + T, b * D + h * DK: b * D + (h + 1) * DK] = 1.0
    # V': rows (h', b', s) ; cols d -> 1 iff h' == d // DK
    vm = np.zeros((HBK, D), np.float32)
    for h in range(H):
        vm[h * B * T:(h + 1) * B * T, h * DK:(h + 1) * DK] = 1.0
    # block-ones matrix summing each Tk-wide (head, batch) key segment
    sg = np.zeros((HBK, HBK), np.float32)
    for g in range(HBK // T):
        sg[g * T:(g + 1) * T, g * T:(g + 1) * T] = 1.0
    return qm, km, vm, sg


def pack_params(params):
    """Pack all weights / LayerNorm params / structural masks into one
    128-lane, 8-row-aligned f32 buffer (single input DMA)."""
    buf = np.zeros((PBUF_ROWS, LANES), np.float32)

    def put(name, arr):
        r0, nr, nc = SLOTS[name]
        buf[r0:r0 + nr, :nc] = np.asarray(arr, np.float32).reshape(nr, nc)

    for li in range(N_LAYERS):
        sfx = str(li)
        # fold the 1/sqrt(dk) attention scale into the Q projections (free,
        # done once at pack time — not a per-call wrapper op)
        wqkv = np.asarray(params["wqkv"][li], np.float32).copy()
        bqkv = np.asarray(params["bqkv"][li], np.float32).copy()
        wqkv[:, :D] *= SCALE
        bqkv[:, :D] *= SCALE
        put("wqkv" + sfx, wqkv)
        put("bqkv" + sfx, bqkv)
        put("wq2" + sfx, np.asarray(params["wq2"][li], np.float32) * SCALE)
        put("bq2" + sfx, np.asarray(params["bq2"][li], np.float32) * SCALE)
        for key in ("wo1", "bo1", "wkv2", "bkv2", "wo2", "bo2",
                    "ln1a", "ln1b", "ln2a", "ln2b", "ln3a", "ln3b",
                    "w1", "b1", "w2", "b2"):
            put(key + sfx, params[key][li])
    put("lnfa", params["lnfa"])
    put("lnfb", params["lnfb"])
    qm, km, vm, sg = _structural_masks()
    put("qmask", qm)
    put("kmaskt", km)
    put("vmask", vm)
    put("seg", sg)
    return jnp.asarray(buf)


def _mask_bias(mask, kv_len):
    """{0,1} mask (B, Tq_or_1, kv_len) -> additive bias in the block-diagonal
    score layout: rows (b, t), cols (head, batch', s). Valid entries get 0.0,
    masked / cross-batch entries get -1e9 (exp underflows to exactly 0)."""
    bsel = (jnp.arange(B)[:, None] == jnp.arange(B)[None, :]).astype(jnp.float32)
    valid = bsel[:, None, None, :, None] * mask[:, :, None, None, :]
    valid = jnp.broadcast_to(valid, (B, T, H, B, kv_len))
    return ((valid - 1.0) * 1e9).reshape(BT, H * B * kv_len).astype(jnp.float32)


def _layer_norm(y, a, b):
    # Matches the PyTorch module exactly: mean over last dim, UNBIASED std
    # (Bessel correction, /(d-1)), and division by (std + eps).
    mean = jnp.mean(y, axis=-1, keepdims=True)
    var = jnp.sum((y - mean) ** 2, axis=-1, keepdims=True) / (y.shape[-1] - 1)
    std = jnp.sqrt(var)
    return a * (y - mean) / (std + EPS) + b


# --------------------------------------------------------------------------
# Kernel
# --------------------------------------------------------------------------
def decoder_kernel(d_ref, p_ref, out_ref):
    def getp(name):
        r0, nr, nc = SLOTS[name]
        return p_ref[r0:r0 + nr, 0:nc]

    x = d_ref[0:BT, 0:D]                       # (B*T, D)
    mem = d_ref[BT:BT + BKV, 0:D]              # (B*S, D)
    tgt_bias = d_ref[2 * BT:3 * BT, 0:HBK]     # (B*T, H*B*T) additive bias
    src_bias = d_ref[3 * BT:4 * BT, 0:HBK]     # (B*T, H*B*S) additive bias

    qmask = getp("qmask")                      # (BT,  B*D)
    kmaskt = getp("kmaskt")                    # (HBK, B*D)
    vmask = getp("vmask")                      # (HBK, D)
    seg = getp("seg")                          # (HBK, HBK)

    def tile(a, rows, cols):
        # explicit concatenates (sublane / lane) — no relayout surprises
        if cols > 1:
            a = jnp.concatenate([a] * cols, axis=1)
        if rows > 1:
            a = jnp.concatenate([a] * rows, axis=0)
        return a

    def mha(q, k, v, bias, wo, bo):
        # Block-diagonal batched multi-head attention: all B*H heads in three
        # MXU matmuls (scores, segmented-softmax denominator, PV) plus one
        # dense output projection. q is already scaled by 1/sqrt(dk).
        q_bd = tile(q, 1, B) * qmask           # (BT,  B*D)
        k_bd = tile(k, H, B) * kmaskt          # (HBK, B*D)
        v_bd = tile(v, H, 1) * vmask           # (HBK, D)
        # scores: contract dim 1 of both operands -> no explicit k transpose
        sc = lax.dot_general(q_bd, k_bd, (((1,), (1,)), ((), ())),
                             preferred_element_type=jnp.float32) + bias
        # one row-wide max is a valid (shift-invariant) stabilizer for every
        # per-(head, batch) segment; cross-batch columns sit at -1e9 -> exp==0
        m = jnp.max(sc, axis=-1, keepdims=True)
        e = jnp.exp(sc - m)
        den = jnp.dot(e, seg, preferred_element_type=jnp.float32)
        # exact divide (approx reciprocal previously broke the 2e-3 tolerance);
        # the max() only guards the all-zero cross-batch segments (0/x -> 0).
        p = e / jnp.maximum(den, 1e-30)
        o = jnp.dot(p, v_bd, preferred_element_type=jnp.float32)   # (BT, D)
        return jnp.dot(o, wo, preferred_element_type=jnp.float32) + bo

    for li in range(N_LAYERS):                 # static unroll over layers
        sfx = str(li)
        # ---------- masked self-attention sublayer (pre-norm residual) ------
        y = _layer_norm(x, getp("ln1a" + sfx), getp("ln1b" + sfx))
        qkv = jnp.dot(y, getp("wqkv" + sfx),
                      preferred_element_type=jnp.float32) + getp("bqkv" + sfx)
        x = x + mha(qkv[:, 0:D], qkv[:, D:2 * D], qkv[:, 2 * D:3 * D],
                    tgt_bias, getp("wo1" + sfx), getp("bo1" + sfx))

        # ---------- cross-attention over memory (pre-norm residual) ---------
        y = _layer_norm(x, getp("ln2a" + sfx), getp("ln2b" + sfx))
        q2 = jnp.dot(y, getp("wq2" + sfx),
                     preferred_element_type=jnp.float32) + getp("bq2" + sfx)
        kv = jnp.dot(mem, getp("wkv2" + sfx),
                     preferred_element_type=jnp.float32) + getp("bkv2" + sfx)
        x = x + mha(q2, kv[:, 0:D], kv[:, D:2 * D],
                    src_bias, getp("wo2" + sfx), getp("bo2" + sfx))

        # ---------- position-wise feed-forward sublayer ----------------------
        y = _layer_norm(x, getp("ln3a" + sfx), getp("ln3b" + sfx))
        h1 = jnp.maximum(
            jnp.dot(y, getp("w1" + sfx),
                    preferred_element_type=jnp.float32) + getp("b1" + sfx),
            0.0)
        x = x + jnp.dot(h1, getp("w2" + sfx),
                        preferred_element_type=jnp.float32) + getp("b2" + sfx)

    # final Decoder.norm
    out_ref[...] = _layer_norm(x, getp("lnfa"), getp("lnfb"))


# --------------------------------------------------------------------------
# Wrapper
# --------------------------------------------------------------------------
def decoder_forward(x, memory, src_mask, tgt_mask, pbuf):
    x2d = x.reshape(BT, D).astype(jnp.float32)
    mem2d = memory.reshape(BKV, D).astype(jnp.float32)
    # additive mask biases precomputed in the wrapper, already in the
    # block-diagonal score layout the fused score matmul consumes
    tgt_bias = _mask_bias(tgt_mask, T)         # (BT, HBK)
    src_bias = _mask_bias(src_mask, S)         # (BT, HBK)

    pad = lambda a: jnp.pad(a, ((0, 0), (0, HBK - a.shape[1])))
    dbuf = jnp.concatenate([pad(x2d), pad(mem2d), tgt_bias, src_bias], axis=0)

    vmem = pl.BlockSpec(memory_space=pltpu.MemorySpace.VMEM)
    out2d = pl.pallas_call(
        decoder_kernel,
        out_shape=jax.ShapeDtypeStruct((BT, D), jnp.float32),
        in_specs=[vmem, vmem],
        out_specs=vmem,
    )(dbuf, pbuf)
    return out2d.reshape(B, T, D)


# --------------------------------------------------------------------------
# Params + pure-JAX reference (PyTorch-faithful)
# --------------------------------------------------------------------------
def init_params(key):
    ks = jax.random.split(key, 14)

    def rnd(k, shape, fan_in):
        return jax.random.normal(k, shape, jnp.float32) / math.sqrt(fan_in)

    p = {}
    p["wqkv"] = rnd(ks[0], (N_LAYERS, D, 3 * D), D)
    p["bqkv"] = rnd(ks[1], (N_LAYERS, 1, 3 * D), D)
    p["wo1"] = rnd(ks[2], (N_LAYERS, D, D), D)
    p["bo1"] = rnd(ks[3], (N_LAYERS, 1, D), D)
    p["wq2"] = rnd(ks[4], (N_LAYERS, D, D), D)
    p["bq2"] = rnd(ks[5], (N_LAYERS, 1, D), D)
    p["wkv2"] = rnd(ks[6], (N_LAYERS, D, 2 * D), D)
    p["bkv2"] = rnd(ks[7], (N_LAYERS, 1, 2 * D), D)
    p["wo2"] = rnd(ks[8], (N_LAYERS, D, D), D)
    p["bo2"] = rnd(ks[9], (N_LAYERS, 1, D), D)
    p["w1"] = rnd(ks[10], (N_LAYERS, D, DFF), D)
    p["b1"] = rnd(ks[11], (N_LAYERS, 1, DFF), D)
    p["w2"] = rnd(ks[12], (N_LAYERS, DFF, D), DFF)
    p["b2"] = rnd(ks[13], (N_LAYERS, 1, D), DFF)
    for n in ("ln1", "ln2", "ln3"):
        p[n + "a"] = jnp.ones((N_LAYERS, 1, D), jnp.float32)
        p[n + "b"] = jnp.zeros((N_LAYERS, 1, D), jnp.float32)
    p["lnfa"] = jnp.ones((1, D), jnp.float32)
    p["lnfb"] = jnp.zeros((1, D), jnp.float32)
    return p


def decoder_reference(x, memory, src_mask, tgt_mask, p):
    """Pure-JAX reference mirroring the PyTorch Decoder forward semantics."""
    scale = 1.0 / math.sqrt(DK)

    def attn(q, k, v, mask):
        Bq, Tq, _ = q.shape
        Tk = k.shape[1]
        qh = q.reshape(Bq, Tq, H, DK).transpose(0, 2, 1, 3)
        kh = k.reshape(Bq, Tk, H, DK).transpose(0, 2, 1, 3)
        vh = v.reshape(Bq, Tk, H, DK).transpose(0, 2, 1, 3)
        sc = jnp.einsum("bhqd,bhkd->bhqk", qh, kh) * scale
        sc = jnp.where(mask[:, None, :, :] == 0.0, -1e9, sc)
        pa = jax.nn.softmax(sc, axis=-1)
        o = jnp.einsum("bhqk,bhkd->bhqd", pa, vh)
        return o.transpose(0, 2, 1, 3).reshape(Bq, Tq, D)

    for li in range(N_LAYERS):
        wq, wk, wv = (p["wqkv"][li][:, :D], p["wqkv"][li][:, D:2 * D],
                      p["wqkv"][li][:, 2 * D:])
        bq, bk, bv = (p["bqkv"][li][:, :D], p["bqkv"][li][:, D:2 * D],
                      p["bqkv"][li][:, 2 * D:])
        y = _layer_norm(x, p["ln1a"][li], p["ln1b"][li])
        a = attn(y @ wq + bq, y @ wk + bk, y @ wv + bv, tgt_mask)
        x = x + (a @ p["wo1"][li] + p["bo1"][li])

        y = _layer_norm(x, p["ln2a"][li], p["ln2b"][li])
        wk2, wv2 = p["wkv2"][li][:, :D], p["wkv2"][li][:, D:]
        bk2, bv2 = p["bkv2"][li][:, :D], p["bkv2"][li][:, D:]
        a = attn(y @ p["wq2"][li] + p["bq2"][li],
                 memory @ wk2 + bk2, memory @ wv2 + bv2, src_mask)
        x = x + (a @ p["wo2"][li] + p["bo2"][li])

        y = _layer_norm(x, p["ln3a"][li], p["ln3b"][li])
        h1 = jnp.maximum(y @ p["w1"][li] + p["b1"][li], 0.0)
        x = x + (h1 @ p["w2"][li] + p["b2"][li])
    return _layer_norm(x, p["lnfa"], p["lnfb"])


if __name__ == "__main__":
    key = jax.random.PRNGKey(0)
    kx, kmem, kp = jax.random.split(key, 3)
    x = jax.random.normal(kx, (B, T, D), jnp.float32)
    memory = jax.random.normal(kmem, (B, S, D), jnp.float32)

    # tgt_mask: padding mask & subsequent (causal) mask -> (B, T, T)
    tgt_lens = jnp.array([T, T - 2])
    pad_t = jnp.arange(T)[None, :] < tgt_lens[:, None]          # (B, T)
    sub = jnp.tril(jnp.ones((T, T), dtype=bool))                # (T, T)
    tgt_mask = (pad_t[:, None, :] & sub[None, :, :]).astype(jnp.float32)
    # src_mask: padding mask over memory positions -> (B, 1, S)
    src_lens = jnp.array([S, S - 3])
    src_mask = (jnp.arange(S)[None, :] <
                src_lens[:, None]).astype(jnp.float32)[:, None, :]

    params = init_params(kp)
    pbuf = pack_params(params)

    out = decoder_forward(x, memory, src_mask, tgt_mask, pbuf)
    jax.block_until_ready(out)

    ref = decoder_reference(x, memory, src_mask, tgt_mask, params)
    np.testing.assert_allclose(np.asarray(out), np.asarray(ref),
                               atol=2e-3, rtol=2e-3)
    print("KERNEL_OK")
</pallas_src>

<mosaic_0001>
module attributes {stable_mosaic.version = 11 : i64} {
  func.func @decoder_kernel(%arg0: memref<64x64xf32, #tpu.memory_space<vmem>>, %arg1: memref<944x128xf32, #tpu.memory_space<vmem>>, %arg2: memref<16x32xf32, #tpu.memory_space<vmem>>) attributes {dimension_semantics = [], scalar_prefetch = 0 : i64, scratch_operands = 0 : i64, tpu.core_type = #tpu.core_type<tc>} {
    %c0 = arith.constant 0 : index
    %c0_0 = arith.constant 0 : index
    %0 = vector.load %arg0[%c0, %c0_0] : memref<64x64xf32, #tpu.memory_space<vmem>>, vector<16x32xf32>
    %c16 = arith.constant 16 : index
    %c0_1 = arith.constant 0 : index
    %1 = vector.load %arg0[%c16, %c0_1] : memref<64x64xf32, #tpu.memory_space<vmem>>, vector<16x32xf32>
    %c32 = arith.constant 32 : index
    %c0_2 = arith.constant 0 : index
    %2 = vector.load %arg0[%c32, %c0_2] : memref<64x64xf32, #tpu.memory_space<vmem>>, vector<16x64xf32>
    %c48 = arith.constant 48 : index
    %c0_3 = arith.constant 0 : index
    %3 = vector.load %arg0[%c48, %c0_3] : memref<64x64xf32, #tpu.memory_space<vmem>>, vector<16x64xf32>
    %c736 = arith.constant 736 : index
    %c0_4 = arith.constant 0 : index
    %4 = vector.load %arg1[%c736, %c0_4] : memref<944x128xf32, #tpu.memory_space<vmem>>, vector<16x64xf32>
    %c752 = arith.constant 752 : index
    %c0_5 = arith.constant 0 : index
    %5 = vector.load %arg1[%c752, %c0_5] : memref<944x128xf32, #tpu.memory_space<vmem>>, vector<64x64xf32>
    %c816 = arith.constant 816 : index
    %c0_6 = arith.constant 0 : index
    %6 = vector.load %arg1[%c816, %c0_6] : memref<944x128xf32, #tpu.memory_space<vmem>>, vector<64x32xf32>
    %c880 = arith.constant 880 : index
    %c0_7 = arith.constant 0 : index
    %7 = vector.load %arg1[%c880, %c0_7] : memref<944x128xf32, #tpu.memory_space<vmem>>, vector<64x64xf32>
    %c200 = arith.constant 200 : index
    %c0_8 = arith.constant 0 : index
    %8 = vector.load %arg1[%c200, %c0_8] : memref<944x128xf32, #tpu.memory_space<vmem>>, vector<1x32xf32>
    %c208 = arith.constant 208 : index
    %c0_9 = arith.constant 0 : index
    %9 = vector.load %arg1[%c208, %c0_9] : memref<944x128xf32, #tpu.memory_space<vmem>>, vector<1x32xf32>
    %cst = arith.constant dense<0.000000e+00> : vector<16xf32>
    %10 = vector.multi_reduction <add>, %0, %cst [1] : vector<16x32xf32> to vector<16xf32>
    %11 = vector.shape_cast %10 : vector<16xf32> to vector<16x1xf32>
    %cst_10 = arith.constant 3.200000e+01 : f32
    %12 = vector.broadcast %cst_10 : f32 to vector<16x1xf32>
    %13 = arith.divf %11, %12 : vector<16x1xf32>
    %14 = vector.broadcast %13 : vector<16x1xf32> to vector<16x32xf32>
    %15 = arith.subf %0, %14 : vector<16x32xf32>
    %16 = arith.mulf %15, %15 : vector<16x32xf32>
    %cst_11 = arith.constant dense<0.000000e+00> : vector<16xf32>
    %17 = vector.multi_reduction <add>, %16, %cst_11 [1] : vector<16x32xf32> to vector<16xf32>
    %18 = vector.shape_cast %17 : vector<16xf32> to vector<16x1xf32>
    %cst_12 = arith.constant 3.100000e+01 : f32
    %19 = vector.broadcast %cst_12 : f32 to vector<16x1xf32>
    %20 = arith.divf %18, %19 : vector<16x1xf32>
    %21 = math.sqrt %20 : vector<16x1xf32>
    %22 = vector.broadcast %13 : vector<16x1xf32> to vector<16x32xf32>
    %23 = arith.subf %0, %22 : vector<16x32xf32>
    %24 = vector.broadcast %8 : vector<1x32xf32> to vector<16x32xf32>
    %25 = arith.mulf %24, %23 : vector<16x32xf32>
    %cst_13 = arith.constant 9.99999997E-7 : f32
    %26 = vector.broadcast %cst_13 : f32 to vector<16x1xf32>
    %27 = arith.addf %21, %26 : vector<16x1xf32>
    %28 = vector.broadcast %27 : vector<16x1xf32> to vector<16x32xf32>
    %29 = arith.divf %25, %28 : vector<16x32xf32>
    %30 = vector.broadcast %9 : vector<1x32xf32> to vector<16x32xf32>
    %31 = arith.addf %29, %30 : vector<16x32xf32>
    %c0_14 = arith.constant 0 : index
    %c0_15 = arith.constant 0 : index
    %32 = vector.load %arg1[%c0_14, %c0_15] : memref<944x128xf32, #tpu.memory_space<vmem>>, vector<32x96xf32>
    %cst_16 = arith.constant dense<0.000000e+00> : vector<16x96xf32>
    %33 = tpu.matmul %31, %32, %cst_16 {dimension_numbers = #tpu.dot_dimension_numbers<[1], [0], [0], [1], [0, 0, 1, 1], [], []>} : vector<16x32xf32>, vector<32x96xf32>, vector<16x96xf32> -> vector<16x96xf32>
    %c32_17 = arith.constant 32 : index
    %c0_18 = arith.constant 0 : index
    %34 = vector.load %arg1[%c32_17, %c0_18] : memref<944x128xf32, #tpu.memory_space<vmem>>, vector<1x96xf32>
    %35 = vector.broadcast %34 : vector<1x96xf32> to vector<16x96xf32>
    %36 = arith.addf %33, %35 : vector<16x96xf32>
    %37 = vector.extract_strided_slice %36 {offsets = [0, 0], sizes = [16, 32], strides = [1, 1]} : vector<16x96xf32> to vector<16x32xf32>
    %38 = vector.extract_strided_slice %36 {offsets = [0, 32], sizes = [16, 32], strides = [1, 1]} : vector<16x96xf32> to vector<16x32xf32>
    %39 = vector.extract_strided_slice %36 {offsets = [0, 64], sizes = [16, 32], strides = [1, 1]} : vector<16x96xf32> to vector<16x32xf32>
    %c40 = arith.constant 40 : index
    %c0_19 = arith.constant 0 : index
    %40 = vector.load %arg1[%c40, %c0_19] : memref<944x128xf32, #tpu.memory_space<vmem>>, vector<32x32xf32>
    %c72 = arith.constant 72 : index
    %c0_20 = arith.constant 0 : index
    %41 = vector.load %arg1[%c72, %c0_20] : memref<944x128xf32, #tpu.memory_space<vmem>>, vector<1x32xf32>
    %42 = tpu.concatenate %37, %37 in 1 : vector<16x32xf32>, vector<16x32xf32> -> vector<16x64xf32>
    %43 = arith.mulf %42, %4 : vector<16x64xf32>
    %44 = tpu.concatenate %38, %38 in 1 : vector<16x32xf32>, vector<16x32xf32> -> vector<16x64xf32>
    %45 = tpu.concatenate %44, %44, %44, %44 in 0 : vector<16x64xf32>, vector<16x64xf32>, vector<16x64xf32>, vector<16x64xf32> -> vector<64x64xf32>
    %46 = arith.mulf %45, %5 : vector<64x64xf32>
    %47 = tpu.concatenate %39, %39, %39, %39 in 0 : vector<16x32xf32>, vector<16x32xf32>, vector<16x32xf32>, vector<16x32xf32> -> vector<64x32xf32>
    %48 = arith.mulf %47, %6 : vector<64x32xf32>
    %cst_21 = arith.constant dense<0.000000e+00> : vector<16x64xf32>
    %49 = tpu.matmul %43, %46, %cst_21 {dimension_numbers = #tpu.dot_dimension_numbers<[1], [1], [0], [0], [0, 0, 1, 0], [], []>} : vector<16x64xf32>, vector<64x64xf32>, vector<16x64xf32> -> vector<16x64xf32>
    %50 = arith.addf %49, %2 : vector<16x64xf32>
    %cst_22 = arith.constant dense<0xFF800000> : vector<16xf32>
    %51 = vector.multi_reduction <maximumf>, %50, %cst_22 [1] : vector<16x64xf32> to vector<16xf32>
    %52 = vector.shape_cast %51 : vector<16xf32> to vector<16x1xf32>
    %53 = vector.broadcast %52 : vector<16x1xf32> to vector<16x64xf32>
    %54 = arith.subf %50, %53 : vector<16x64xf32>
    %55 = math.exp %54 : vector<16x64xf32>
    %cst_23 = arith.constant dense<0.000000e+00> : vector<16x64xf32>
    %56 = tpu.matmul %55, %7, %cst_23 {dimension_numbers = #tpu.dot_dimension_numbers<[1], [0], [0], [1], [0, 0, 1, 1], [], []>} : vector<16x64xf32>, vector<64x64xf32>, vector<16x64xf32> -> vector<16x64xf32>
    %cst_24 = arith.constant 1.000000e-30 : f32
    %57 = vector.broadcast %cst_24 : f32 to vector<16x64xf32>
    %58 = arith.maximumf %56, %57 : vector<16x64xf32>
    %59 = arith.divf %55, %58 : vector<16x64xf32>
    %cst_25 = arith.constant dense<0.000000e+00> : vector<16x32xf32>
    %60 = tpu.matmul %59, %48, %cst_25 {dimension_numbers = #tpu.dot_dimension_numbers<[1], [0], [0], [1], [0, 0, 1, 1], [], []>} : vector<16x64xf32>, vector<64x32xf32>, vector<16x32xf32> -> vector<16x32xf32>
    %cst_26 = arith.constant dense<0.000000e+00> : vector<16x32xf32>
    %61 = tpu.matmul %60, %40, %cst_26 {dimension_numbers = #tpu.dot_dimension_numbers<[1], [0], [0], [1], [0, 0, 1, 1], [], []>} : vector<16x32xf32>, vector<32x32xf32>, vector<16x32xf32> -> vector<16x32xf32>
    %62 = vector.broadcast %41 : vector<1x32xf32> to vector<16x32xf32>
    %63 = arith.addf %61, %62 : vector<16x32xf32>
    %64 = arith.addf %0, %63 : vector<16x32xf32>
    %c216 = arith.constant 216 : index
    %c0_27 = arith.constant 0 : index
    %65 = vector.load %arg1[%c216, %c0_27] : memref<944x128xf32, #tpu.memory_space<vmem>>, vector<1x32xf32>
    %c224 = arith.constant 224 : index
    %c0_28 = arith.constant 0 : index
    %66 = vector.load %arg1[%c224, %c0_28] : memref<944x128xf32, #tpu.memory_space<vmem>>, vector<1x32xf32>
    %cst_29 = arith.constant dense<0.000000e+00> : vector<16xf32>
    %67 = vector.multi_reduction <add>, %64, %cst_29 [1] : vector<16x32xf32> to vector<16xf32>
    %68 = vector.shape_cast %67 : vector<16xf32> to vector<16x1xf32>
    %cst_30 = arith.constant 3.200000e+01 : f32
    %69 = vector.broadcast %cst_30 : f32 to vector<16x1xf32>
    %70 = arith.divf %68, %69 : vector<16x1xf32>
    %71 = vector.broadcast %70 : vector<16x1xf32> to vector<16x32xf32>
    %72 = arith.subf %64, %71 : vector<16x32xf32>
    %73 = arith.mulf %72, %72 : vector<16x32xf32>
    %cst_31 = arith.constant dense<0.000000e+00> : vector<16xf32>
    %74 = vector.multi_reduction <add>, %73, %cst_31 [1] : vector<16x32xf32> to vector<16xf32>
    %75 = vector.shape_cast %74 : vector<16xf32> to vector<16x1xf32>
    %cst_32 = arith.constant 3.100000e+01 : f32
    %76 = vector.broadcast %cst_32 : f32 to vector<16x1xf32>
    %77 = arith.divf %75, %76 : vector<16x1xf32>
    %78 = math.sqrt %77 : vector<16x1xf32>
    %79 = vector.broadcast %70 : vector<16x1xf32> to vector<16x32xf32>
    %80 = arith.subf %64, %79 : vector<16x32xf32>
    %81 = vector.broadcast %65 : vector<1x32xf32> to vector<16x32xf32>
    %82 = arith.mulf %81, %80 : vector<16x32xf32>
    %cst_33 = arith.constant 9.99999997E-7 : f32
    %83 = vector.broadcast %cst_33 : f32 to vector<16x1xf32>
    %84 = arith.addf %78, %83 : vector<16x1xf32>
    %85 = vector.broadcast %84 : vector<16x1xf32> to vector<16x32xf32>
    %86 = arith.divf %82, %85 : vector<16x32xf32>
    %87 = vector.broadcast %66 : vector<1x32xf32> to vector<16x32xf32>
    %88 = arith.addf %86, %87 : vector<16x32xf32>
    %c80 = arith.constant 80 : index
    %c0_34 = arith.constant 0 : index
    %89 = vector.load %arg1[%c80, %c0_34] : memref<944x128xf32, #tpu.memory_space<vmem>>, vector<32x32xf32>
    %cst_35 = arith.constant dense<0.000000e+00> : vector<16x32xf32>
    %90 = tpu.matmul %88, %89, %cst_35 {dimension_numbers = #tpu.dot_dimension_numbers<[1], [0], [0], [1], [0, 0, 1, 1], [], []>} : vector<16x32xf32>, vector<32x32xf32>, vector<16x32xf32> -> vector<16x32xf32>
    %c112 = arith.constant 112 : index
    %c0_36 = arith.constant 0 : index
    %91 = vector.load %arg1[%c112, %c0_36] : memref<944x128xf32, #tpu.memory_space<vmem>>, vector<1x32xf32>
    %92 = vector.broadcast %91 : vector<1x32xf32> to vector<16x32xf32>
    %93 = arith.addf %90, %92 : vector<16x32xf32>
    %c120 = arith.constant 120 : index
    %c0_37 = arith.constant 0 : index
    %94 = vector.load %arg1[%c120, %c0_37] : memref<944x128xf32, #tpu.memory_space<vmem>>, vector<32x64xf32>
    %cst_38 = arith.constant dense<0.000000e+00> : vector<16x64xf32>
    %95 = tpu.matmul %1, %94, %cst_38 {dimension_numbers = #tpu.dot_dimension_numbers<[1], [0], [0], [1], [0, 0, 1, 1], [], []>} : vector<16x32xf32>, vector<32x64xf32>, vector<16x64xf32> -> vector<16x64xf32>
    %c152 = arith.constant 152 : index
    %c0_39 = arith.constant 0 : index
    %96 = vector.load %arg1[%c152, %c0_39] : memref<944x128xf32, #tpu.memory_space<vmem>>, vector<1x64xf32>
    %97 = vector.broadcast %96 : vector<1x64xf32> to vector<16x64xf32>
    %98 = arith.addf %95, %97 : vector<16x64xf32>
    %99 = vector.extract_strided_slice %98 {offsets = [0, 0], sizes = [16, 32], strides = [1, 1]} : vector<16x64xf32> to vector<16x32xf32>
    %100 = vector.extract_strided_slice %98 {offsets = [0, 32], sizes = [16, 32], strides = [1, 1]} : vector<16x64xf32> to vector<16x32xf32>
    %c160 = arith.constant 160 : index
    %c0_40 = arith.constant 0 : index
    %101 = vector.load %arg1[%c160, %c0_40] : memref<944x128xf32, #tpu.memory_space<vmem>>, vector<32x32xf32>
    %c192 = arith.constant 192 : index
    %c0_41 = arith.constant 0 : index
    %102 = vector.load %arg1[%c192, %c0_41] : memref<944x128xf32, #tpu.memory_space<vmem>>, vector<1x32xf32>
    %103 = tpu.concatenate %93, %93 in 1 : vector<16x32xf32>, vector<16x32xf32> -> vector<16x64xf32>
    %104 = arith.mulf %103, %4 : vector<16x64xf32>
    %105 = tpu.concatenate %99, %99 in 1 : vector<16x32xf32>, vector<16x32xf32> -> vector<16x64xf32>
    %106 = tpu.concatenate %105, %105, %105, %105 in 0 : vector<16x64xf32>, vector<16x64xf32>, vector<16x64xf32>, vector<16x64xf32> -> vector<64x64xf32>
    %107 = arith.mulf %106, %5 : vector<64x64xf32>
    %108 = tpu.concatenate %100, %100, %100, %100 in 0 : vector<16x32xf32>, vector<16x32xf32>, vector<16x32xf32>, vector<16x32xf32> -> vector<64x32xf32>
    %109 = arith.mulf %108, %6 : vector<64x32xf32>
    %cst_42 = arith.constant dense<0.000000e+00> : vector<16x64xf32>
    %110 = tpu.matmul %104, %107, %cst_42 {dimension_numbers = #tpu.dot_dimension_numbers<[1], [1], [0], [0], [0, 0, 1, 0], [], []>} : vector<16x64xf32>, vector<64x64xf32>, vector<16x64xf32> -> vector<16x64xf32>
    %111 = arith.addf %110, %3 : vector<16x64xf32>
    %cst_43 = arith.constant dense<0xFF800000> : vector<16xf32>
    %112 = vector.multi_reduction <maximumf>, %111, %cst_43 [1] : vector<16x64xf32> to vector<16xf32>
    %113 = vector.shape_cast %112 : vector<16xf32> to vector<16x1xf32>
    %114 = vector.broadcast %113 : vector<16x1xf32> to vector<16x64xf32>
    %115 = arith.subf %111, %114 : vector<16x64xf32>
    %116 = math.exp %115 : vector<16x64xf32>
    %cst_44 = arith.constant dense<0.000000e+00> : vector<16x64xf32>
    %117 = tpu.matmul %116, %7, %cst_44 {dimension_numbers = #tpu.dot_dimension_numbers<[1], [0], [0], [1], [0, 0, 1, 1], [], []>} : vector<16x64xf32>, vector<64x64xf32>, vector<16x64xf32> -> vector<16x64xf32>
    %cst_45 = arith.constant 1.000000e-30 : f32
    %118 = vector.broadcast %cst_45 : f32 to vector<16x64xf32>
    %119 = arith.maximumf %117, %118 : vector<16x64xf32>
    %120 = arith.divf %116, %119 : vector<16x64xf32>
    %cst_46 = arith.constant dense<0.000000e+00> : vector<16x32xf32>
    %121 = tpu.matmul %120, %109, %cst_46 {dimension_numbers = #tpu.dot_dimension_numbers<[1], [0], [0], [1], [0, 0, 1, 1], [], []>} : vector<16x64xf32>, vector<64x32xf32>, vector<16x32xf32> -> vector<16x32xf32>
    %cst_47 = arith.constant dense<0.000000e+00> : vector<16x32xf32>
    %122 = tpu.matmul %121, %101, %cst_47 {dimension_numbers = #tpu.dot_dimension_numbers<[1], [0], [0], [1], [0, 0, 1, 1], [], []>} : vector<16x32xf32>, vector<32x32xf32>, vector<16x32xf32> -> vector<16x32xf32>
    %123 = vector.broadcast %102 : vector<1x32xf32> to vector<16x32xf32>
    %124 = arith.addf %122, %123 : vector<16x32xf32>
    %125 = arith.addf %64, %124 : vector<16x32xf32>
    %c232 = arith.constant 232 : index
    %c0_48 = arith.constant 0 : index
    %126 = vector.load %arg1[%c232, %c0_48] : memref<944x128xf32, #tpu.memory_space<vmem>>, vector<1x32xf32>
    %c240 = arith.constant 240 : index
    %c0_49 = arith.constant 0 : index
    %127 = vector.load %arg1[%c240, %c0_49] : memref<944x128xf32, #tpu.memory_space<vmem>>, vector<1x32xf32>
    %cst_50 = arith.constant dense<0.000000e+00> : vector<16xf32>
    %128 = vector.multi_reduction <add>, %125, %cst_50 [1] : vector<16x32xf32> to vector<16xf32>
    %129 = vector.shape_cast %128 : vector<16xf32> to vector<16x1xf32>
    %cst_51 = arith.constant 3.200000e+01 : f32
    %130 = vector.broadcast %cst_51 : f32 to vector<16x1xf32>
    %131 = arith.divf %129, %130 : vector<16x1xf32>
    %132 = vector.broadcast %131 : vector<16x1xf32> to vector<16x32xf32>
    %133 = arith.subf %125, %132 : vector<16x32xf32>
    %134 = arith.mulf %133, %133 : vector<16x32xf32>
    %cst_52 = arith.constant dense<0.000000e+00> : vector<16xf32>
    %135 = vector.multi_reduction <add>, %134, %cst_52 [1] : vector<16x32xf32> to vector<16xf32>
    %136 = vector.shape_cast %135 : vector<16xf32> to vector<16x1xf32>
    %cst_53 = arith.constant 3.100000e+01 : f32
    %137 = vector.broadcast %cst_53 : f32 to vector<16x1xf32>
    %138 = arith.divf %136, %137 : vector<16x1xf32>
    %139 = math.sqrt %138 : vector<16x1xf32>
    %140 = vector.broadcast %131 : vector<16x1xf32> to vector<16x32xf32>
    %141 = arith.subf %125, %140 : vector<16x32xf32>
    %142 = vector.broadcast %126 : vector<1x32xf32> to vector<16x32xf32>
    %143 = arith.mulf %142, %141 : vector<16x32xf32>
    %cst_54 = arith.constant 9.99999997E-7 : f32
    %144 = vector.broadcast %cst_54 : f32 to vector<16x1xf32>
    %145 = arith.addf %139, %144 : vector<16x1xf32>
    %146 = vector.broadcast %145 : vector<16x1xf32> to vector<16x32xf32>
    %147 = arith.divf %143, %146 : vector<16x32xf32>
    %148 = vector.broadcast %127 : vector<1x32xf32> to vector<16x32xf32>
    %149 = arith.addf %147, %148 : vector<16x32xf32>
    %c248 = arith.constant 248 : index
    %c0_55 = arith.constant 0 : index
    %150 = vector.load %arg1[%c248, %c0_55] : memref<944x128xf32, #tpu.memory_space<vmem>>, vector<32x64xf32>
    %cst_56 = arith.constant dense<0.000000e+00> : vector<16x64xf32>
    %151 = tpu.matmul %149, %150, %cst_56 {dimension_numbers = #tpu.dot_dimension_numbers<[1], [0], [0], [1], [0, 0, 1, 1], [], []>} : vector<16x32xf32>, vector<32x64xf32>, vector<16x64xf32> -> vector<16x64xf32>
    %c280 = arith.constant 280 : index
    %c0_57 = arith.constant 0 : index
    %152 = vector.load %arg1[%c280, %c0_57] : memref<944x128xf32, #tpu.memory_space<vmem>>, vector<1x64xf32>
    %153 = vector.broadcast %152 : vector<1x64xf32> to vector<16x64xf32>
    %154 = arith.addf %151, %153 : vector<16x64xf32>
    %cst_58 = arith.constant 0.000000e+00 : f32
    %155 = vector.broadcast %cst_58 : f32 to vector<16x64xf32>
    %156 = arith.maximumf %154, %155 : vector<16x64xf32>
    %c288 = arith.constant 288 : index
    %c0_59 = arith.constant 0 : index
    %157 = vector.load %arg1[%c288, %c0_59] : memref<944x128xf32, #tpu.memory_space<vmem>>, vector<64x32xf32>
    %cst_60 = arith.constant dense<0.000000e+00> : vector<16x32xf32>
    %158 = tpu.matmul %156, %157, %cst_60 {dimension_numbers = #tpu.dot_dimension_numbers<[1], [0], [0], [1], [0, 0, 1, 1], [], []>} : vector<16x64xf32>, vector<64x32xf32>, vector<16x32xf32> -> vector<16x32xf32>
    %159 = arith.addf %125, %158 : vector<16x32xf32>
    %c352 = arith.constant 352 : index
    %c0_61 = arith.constant 0 : index
    %160 = vector.load %arg1[%c352, %c0_61] : memref<944x128xf32, #tpu.memory_space<vmem>>, vector<1x32xf32>
    %161 = vector.broadcast %160 : vector<1x32xf32> to vector<16x32xf32>
    %162 = arith.addf %159, %161 : vector<16x32xf32>
    %c560 = arith.constant 560 : index
    %c0_62 = arith.constant 0 : index
    %163 = vector.load %arg1[%c560, %c0_62] : memref<944x128xf32, #tpu.memory_space<vmem>>, vector<1x32xf32>
    %c568 = arith.constant 568 : index
    %c0_63 = arith.constant 0 : index
    %164 = vector.load %arg1[%c568, %c0_63] : memref<944x128xf32, #tpu.memory_space<vmem>>, vector<1x32xf32>
    %cst_64 = arith.constant dense<0.000000e+00> : vector<16xf32>
    %165 = vector.multi_reduction <add>, %162, %cst_64 [1] : vector<16x32xf32> to vector<16xf32>
    %166 = vector.shape_cast %165 : vector<16xf32> to vector<16x1xf32>
    %cst_65 = arith.constant 3.200000e+01 : f32
    %167 = vector.broadcast %cst_65 : f32 to vector<16x1xf32>
    %168 = arith.divf %166, %167 : vector<16x1xf32>
    %169 = vector.broadcast %168 : vector<16x1xf32> to vector<16x32xf32>
    %170 = arith.subf %162, %169 : vector<16x32xf32>
    %171 = arith.mulf %170, %170 : vector<16x32xf32>
    %cst_66 = arith.constant dense<0.000000e+00> : vector<16xf32>
    %172 = vector.multi_reduction <add>, %171, %cst_66 [1] : vector<16x32xf32> to vector<16xf32>
    %173 = vector.shape_cast %172 : vector<16xf32> to vector<16x1xf32>
    %cst_67 = arith.constant 3.100000e+01 : f32
    %174 = vector.broadcast %cst_67 : f32 to vector<16x1xf32>
    %175 = arith.divf %173, %174 : vector<16x1xf32>
    %176 = math.sqrt %175 : vector<16x1xf32>
    %177 = vector.broadcast %168 : vector<16x1xf32> to vector<16x32xf32>
    %178 = arith.subf %162, %177 : vector<16x32xf32>
    %179 = vector.broadcast %163 : vector<1x32xf32> to vector<16x32xf32>
    %180 = arith.mulf %179, %178 : vector<16x32xf32>
    %cst_68 = arith.constant 9.99999997E-7 : f32
    %181 = vector.broadcast %cst_68 : f32 to vector<16x1xf32>
    %182 = arith.addf %176, %181 : vector<16x1xf32>
    %183 = vector.broadcast %182 : vector<16x1xf32> to vector<16x32xf32>
    %184 = arith.divf %180, %183 : vector<16x32xf32>
    %185 = vector.broadcast %164 : vector<1x32xf32> to vector<16x32xf32>
    %186 = arith.addf %184, %185 : vector<16x32xf32>
    %c360 = arith.constant 360 : index
    %c0_69 = arith.constant 0 : index
    %187 = vector.load %arg1[%c360, %c0_69] : memref<944x128xf32, #tpu.memory_space<vmem>>, vector<32x96xf32>
    %cst_70 = arith.constant dense<0.000000e+00> : vector<16x96xf32>
    %188 = tpu.matmul %186, %187, %cst_70 {dimension_numbers = #tpu.dot_dimension_numbers<[1], [0], [0], [1], [0, 0, 1, 1], [], []>} : vector<16x32xf32>, vector<32x96xf32>, vector<16x96xf32> -> vector<16x96xf32>
    %c392 = arith.constant 392 : index
    %c0_71 = arith.constant 0 : index
    %189 = vector.load %arg1[%c392, %c0_71] : memref<944x128xf32, #tpu.memory_space<vmem>>, vector<1x96xf32>
    %190 = vector.broadcast %189 : vector<1x96xf32> to vector<16x96xf32>
    %191 = arith.addf %188, %190 : vector<16x96xf32>
    %192 = vector.extract_strided_slice %191 {offsets = [0, 0], sizes = [16, 32], strides = [1, 1]} : vector<16x96xf32> to vector<16x32xf32>
    %193 = vector.extract_strided_slice %191 {offsets = [0, 32], sizes = [16, 32], strides = [1, 1]} : vector<16x96xf32> to vector<16x32xf32>
    %194 = vector.extract_strided_slice %191 {offsets = [0, 64], sizes = [16, 32], strides = [1, 1]} : vector<16x96xf32> to vector<16x32xf32>
    %c400 = arith.constant 400 : index
    %c0_72 = arith.constant 0 : index
    %195 = vector.load %arg1[%c400, %c0_72] : memref<944x128xf32, #tpu.memory_space<vmem>>, vector<32x32xf32>
    %c432 = arith.constant 432 : index
    %c0_73 = arith.constant 0 : index
    %196 = vector.load %arg1[%c432, %c0_73] : memref<944x128xf32, #tpu.memory_space<vmem>>, vector<1x32xf32>
    %197 = tpu.concatenate %192, %192 in 1 : vector<16x32xf32>, vector<16x32xf32> -> vector<16x64xf32>
    %198 = arith.mulf %197, %4 : vector<16x64xf32>
    %199 = tpu.concatenate %193, %193 in 1 : vector<16x32xf32>, vector<16x32xf32> -> vector<16x64xf32>
    %200 = tpu.concatenate %199, %199, %199, %199 in 0 : vector<16x64xf32>, vector<16x64xf32>, vector<16x64xf32>, vector<16x64xf32> -> vector<64x64xf32>
    %201 = arith.mulf %200, %5 : vector<64x64xf32>
    %202 = tpu.concatenate %194, %194, %194, %194 in 0 : vector<16x32xf32>, vector<16x32xf32>, vector<16x32xf32>, vector<16x32xf32> -> vector<64x32xf32>
    %203 = arith.mulf %202, %6 : vector<64x32xf32>
    %cst_74 = arith.constant dense<0.000000e+00> : vector<16x64xf32>
    %204 = tpu.matmul %198, %201, %cst_74 {dimension_numbers = #tpu.dot_dimension_numbers<[1], [1], [0], [0], [0, 0, 1, 0], [], []>} : vector<16x64xf32>, vector<64x64xf32>, vector<16x64xf32> -> vector<16x64xf32>
    %205 = arith.addf %204, %2 : vector<16x64xf32>
    %cst_75 = arith.constant dense<0xFF800000> : vector<16xf32>
    %206 = vector.multi_reduction <maximumf>, %205, %cst_75 [1] : vector<16x64xf32> to vector<16xf32>
    %207 = vector.shape_cast %206 : vector<16xf32> to vector<16x1xf32>
    %208 = vector.broadcast %207 : vector<16x1xf32> to vector<16x64xf32>
    %209 = arith.subf %205, %208 : vector<16x64xf32>
    %210 = math.exp %209 : vector<16x64xf32>
    %cst_76 = arith.constant dense<0.000000e+00> : vector<16x64xf32>
    %211 = tpu.matmul %210, %7, %cst_76 {dimension_numbers = #tpu.dot_dimension_numbers<[1], [0], [0], [1], [0, 0, 1, 1], [], []>} : vector<16x64xf32>, vector<64x64xf32>, vector<16x64xf32> -> vector<16x64xf32>
    %cst_77 = arith.constant 1.000000e-30 : f32
    %212 = vector.broadcast %cst_77 : f32 to vector<16x64xf32>
    %213 = arith.maximumf %211, %212 : vector<16x64xf32>
    %214 = arith.divf %210, %213 : vector<16x64xf32>
    %cst_78 = arith.constant dense<0.000000e+00> : vector<16x32xf32>
    %215 = tpu.matmul %214, %203, %cst_78 {dimension_numbers = #tpu.dot_dimension_numbers<[1], [0], [0], [1], [0, 0, 1, 1], [], []>} : vector<16x64xf32>, vector<64x32xf32>, vector<16x32xf32> -> vector<16x32xf32>
    %cst_79 = arith.constant dense<0.000000e+00> : vector<16x32xf32>
    %216 = tpu.matmul %215, %195, %cst_79 {dimension_numbers = #tpu.dot_dimension_numbers<[1], [0], [0], [1], [0, 0, 1, 1], [], []>} : vector<16x32xf32>, vector<32x32xf32>, vector<16x32xf32> -> vector<16x32xf32>
    %217 = vector.broadcast %196 : vector<1x32xf32> to vector<16x32xf32>
    %218 = arith.addf %216, %217 : vector<16x32xf32>
    %219 = arith.addf %162, %218 : vector<16x32xf32>
    %c576 = arith.constant 576 : index
    %c0_80 = arith.constant 0 : index
    %220 = vector.load %arg1[%c576, %c0_80] : memref<944x128xf32, #tpu.memory_space<vmem>>, vector<1x32xf32>
    %c584 = arith.constant 584 : index
    %c0_81 = arith.constant 0 : index
    %221 = vector.load %arg1[%c584, %c0_81] : memref<944x128xf32, #tpu.memory_space<vmem>>, vector<1x32xf32>
    %cst_82 = arith.constant dense<0.000000e+00> : vector<16xf32>
    %222 = vector.multi_reduction <add>, %219, %cst_82 [1] : vector<16x32xf32> to vector<16xf32>
    %223 = vector.shape_cast %222 : vector<16xf32> to vector<16x1xf32>
    %cst_83 = arith.constant 3.200000e+01 : f32
    %224 = vector.broadcast %cst_83 : f32 to vector<16x1xf32>
    %225 = arith.divf %223, %224 : vector<16x1xf32>
    %226 = vector.broadcast %225 : vector<16x1xf32> to vector<16x32xf32>
    %227 = arith.subf %219, %226 : vector<16x32xf32>
    %228 = arith.mulf %227, %227 : vector<16x32xf32>
    %cst_84 = arith.constant dense<0.000000e+00> : vector<16xf32>
    %229 = vector.multi_reduction <add>, %228, %cst_84 [1] : vector<16x32xf32> to vector<16xf32>
    %230 = vector.shape_cast %229 : vector<16xf32> to vector<16x1xf32>
    %cst_85 = arith.constant 3.100000e+01 : f32
    %231 = vector.broadcast %cst_85 : f32 to vector<16x1xf32>
    %232 = arith.divf %230, %231 : vector<16x1xf32>
    %233 = math.sqrt %232 : vector<16x1xf32>
    %234 = vector.broadcast %225 : vector<16x1xf32> to vector<16x32xf32>
    %235 = arith.subf %219, %234 : vector<16x32xf32>
    %236 = vector.broadcast %220 : vector<1x32xf32> to vector<16x32xf32>
    %237 = arith.mulf %236, %235 : vector<16x32xf32>
    %cst_86 = arith.constant 9.99999997E-7 : f32
    %238 = vector.broadcast %cst_86 : f32 to vector<16x1xf32>
    %239 = arith.addf %233, %238 : vector<16x1xf32>
    %240 = vector.broadcast %239 : vector<16x1xf32> to vector<16x32xf32>
    %241 = arith.divf %237, %240 : vector<16x32xf32>
    %242 = vector.broadcast %221 : vector<1x32xf32> to vector<16x32xf32>
    %243 = arith.addf %241, %242 : vector<16x32xf32>
    %c440 = arith.constant 440 : index
    %c0_87 = arith.constant 0 : index
    %244 = vector.load %arg1[%c440, %c0_87] : memref<944x128xf32, #tpu.memory_space<vmem>>, vector<32x32xf32>
    %cst_88 = arith.constant dense<0.000000e+00> : vector<16x32xf32>
    %245 = tpu.matmul %243, %244, %cst_88 {dimension_numbers = #tpu.dot_dimension_numbers<[1], [0], [0], [1], [0, 0, 1, 1], [], []>} : vector<16x32xf32>, vector<32x32xf32>, vector<16x32xf32> -> vector<16x32xf32>
    %c472 = arith.constant 472 : index
    %c0_89 = arith.constant 0 : index
    %246 = vector.load %arg1[%c472, %c0_89] : memref<944x128xf32, #tpu.memory_space<vmem>>, vector<1x32xf32>
    %247 = vector.broadcast %246 : vector<1x32xf32> to vector<16x32xf32>
    %248 = arith.addf %245, %247 : vector<16x32xf32>
    %c480 = arith.constant 480 : index
    %c0_90 = arith.constant 0 : index
    %249 = vector.load %arg1[%c480, %c0_90] : memref<944x128xf32, #tpu.memory_space<vmem>>, vector<32x64xf32>
    %cst_91 = arith.constant dense<0.000000e+00> : vector<16x64xf32>
    %250 = tpu.matmul %1, %249, %cst_91 {dimension_numbers = #tpu.dot_dimension_numbers<[1], [0], [0], [1], [0, 0, 1, 1], [], []>} : vector<16x32xf32>, vector<32x64xf32>, vector<16x64xf32> -> vector<16x64xf32>
    %c512 = arith.constant 512 : index
    %c0_92 = arith.constant 0 : index
    %251 = vector.load %arg1[%c512, %c0_92] : memref<944x128xf32, #tpu.memory_space<vmem>>, vector<1x64xf32>
    %252 = vector.broadcast %251 : vector<1x64xf32> to vector<16x64xf32>
    %253 = arith.addf %250, %252 : vector<16x64xf32>
    %254 = vector.extract_strided_slice %253 {offsets = [0, 0], sizes = [16, 32], strides = [1, 1]} : vector<16x64xf32> to vector<16x32xf32>
    %255 = vector.extract_strided_slice %253 {offsets = [0, 32], sizes = [16, 32], strides = [1, 1]} : vector<16x64xf32> to vector<16x32xf32>
    %c520 = arith.constant 520 : index
    %c0_93 = arith.constant 0 : index
    %256 = vector.load %arg1[%c520, %c0_93] : memref<944x128xf32, #tpu.memory_space<vmem>>, vector<32x32xf32>
    %c552 = arith.constant 552 : index
    %c0_94 = arith.constant 0 : index
    %257 = vector.load %arg1[%c552, %c0_94] : memref<944x128xf32, #tpu.memory_space<vmem>>, vector<1x32xf32>
    %258 = tpu.concatenate %248, %248 in 1 : vector<16x32xf32>, vector<16x32xf32> -> vector<16x64xf32>
    %259 = arith.mulf %258, %4 : vector<16x64xf32>
    %260 = tpu.concatenate %254, %254 in 1 : vector<16x32xf32>, vector<16x32xf32> -> vector<16x64xf32>
    %261 = tpu.concatenate %260, %260, %260, %260 in 0 : vector<16x64xf32>, vector<16x64xf32>, vector<16x64xf32>, vector<16x64xf32> -> vector<64x64xf32>
    %262 = arith.mulf %261, %5 : vector<64x64xf32>
    %263 = tpu.concatenate %255, %255, %255, %255 in 0 : vector<16x32xf32>, vector<16x32xf32>, vector<16x32xf32>, vector<16x32xf32> -> vector<64x32xf32>
    %264 = arith.mulf %263, %6 : vector<64x32xf32>
    %cst_95 = arith.constant dense<0.000000e+00> : vector<16x64xf32>
    %265 = tpu.matmul %259, %262, %cst_95 {dimension_numbers = #tpu.dot_dimension_numbers<[1], [1], [0], [0], [0, 0, 1, 0], [], []>} : vector<16x64xf32>, vector<64x64xf32>, vector<16x64xf32> -> vector<16x64xf32>
    %266 = arith.addf %265, %3 : vector<16x64xf32>
    %cst_96 = arith.constant dense<0xFF800000> : vector<16xf32>
    %267 = vector.multi_reduction <maximumf>, %266, %cst_96 [1] : vector<16x64xf32> to vector<16xf32>
    %268 = vector.shape_cast %267 : vector<16xf32> to vector<16x1xf32>
    %269 = vector.broadcast %268 : vector<16x1xf32> to vector<16x64xf32>
    %270 = arith.subf %266, %269 : vector<16x64xf32>
    %271 = math.exp %270 : vector<16x64xf32>
    %cst_97 = arith.constant dense<0.000000e+00> : vector<16x64xf32>
    %272 = tpu.matmul %271, %7, %cst_97 {dimension_numbers = #tpu.dot_dimension_numbers<[1], [0], [0], [1], [0, 0, 1, 1], [], []>} : vector<16x64xf32>, vector<64x64xf32>, vector<16x64xf32> -> vector<16x64xf32>
    %cst_98 = arith.constant 1.000000e-30 : f32
    %273 = vector.broadcast %cst_98 : f32 to vector<16x64xf32>
    %274 = arith.maximumf %272, %273 : vector<16x64xf32>
    %275 = arith.divf %271, %274 : vector<16x64xf32>
    %cst_99 = arith.constant dense<0.000000e+00> : vector<16x32xf32>
    %276 = tpu.matmul %275, %264, %cst_99 {dimension_numbers = #tpu.dot_dimension_numbers<[1], [0], [0], [1], [0, 0, 1, 1], [], []>} : vector<16x64xf32>, vector<64x32xf32>, vector<16x32xf32> -> vector<16x32xf32>
    %cst_100 = arith.constant dense<0.000000e+00> : vector<16x32xf32>
    %277 = tpu.matmul %276, %256, %cst_100 {dimension_numbers = #tpu.dot_dimension_numbers<[1], [0], [0], [1], [0, 0, 1, 1], [], []>} : vector<16x32xf32>, vector<32x32xf32>, vector<16x32xf32> -> vector<16x32xf32>
    %278 = vector.broadcast %257 : vector<1x32xf32> to vector<16x32xf32>
    %279 = arith.addf %277, %278 : vector<16x32xf32>
    %280 = arith.addf %219, %279 : vector<16x32xf32>
    %c592 = arith.constant 592 : index
    %c0_101 = arith.constant 0 : index
    %281 = vector.load %arg1[%c592, %c0_101] : memref<944x128xf32, #tpu.memory_space<vmem>>, vector<1x32xf32>
    %c600 = arith.constant 600 : index
    %c0_102 = arith.constant 0 : index
    %282 = vector.load %arg1[%c600, %c0_102] : memref<944x128xf32, #tpu.memory_space<vmem>>, vector<1x32xf32>
    %cst_103 = arith.constant dense<0.000000e+00> : vector<16xf32>
    %283 = vector.multi_reduction <add>, %280, %cst_103 [1] : vector<16x32xf32> to vector<16xf32>
    %284 = vector.shape_cast %283 : vector<16xf32> to vector<16x1xf32>
    %cst_104 = arith.constant 3.200000e+01 : f32
    %285 = vector.broadcast %cst_104 : f32 to vector<16x1xf32>
    %286 = arith.divf %284, %285 : vector<16x1xf32>
    %287 = vector.broadcast %286 : vector<16x1xf32> to vector<16x32xf32>
    %288 = arith.subf %280, %287 : vector<16x32xf32>
    %289 = arith.mulf %288, %288 : vector<16x32xf32>
    %cst_105 = arith.constant dense<0.000000e+00> : vector<16xf32>
    %290 = vector.multi_reduction <add>, %289, %cst_105 [1] : vector<16x32xf32> to vector<16xf32>
    %291 = vector.shape_cast %290 : vector<16xf32> to vector<16x1xf32>
    %cst_106 = arith.constant 3.100000e+01 : f32
    %292 = vector.broadcast %cst_106 : f32 to vector<16x1xf32>
    %293 = arith.divf %291, %292 : vector<16x1xf32>
    %294 = math.sqrt %293 : vector<16x1xf32>
    %295 = vector.broadcast %286 : vector<16x1xf32> to vector<16x32xf32>
    %296 = arith.subf %280, %295 : vector<16x32xf32>
    %297 = vector.broadcast %281 : vector<1x32xf32> to vector<16x32xf32>
    %298 = arith.mulf %297, %296 : vector<16x32xf32>
    %cst_107 = arith.constant 9.99999997E-7 : f32
    %299 = vector.broadcast %cst_107 : f32 to vector<16x1xf32>
    %300 = arith.addf %294, %299 : vector<16x1xf32>
    %301 = vector.broadcast %300 : vector<16x1xf32> to vector<16x32xf32>
    %302 = arith.divf %298, %301 : vector<16x32xf32>
    %303 = vector.broadcast %282 : vector<1x32xf32> to vector<16x32xf32>
    %304 = arith.addf %302, %303 : vector<16x32xf32>
    %c608 = arith.constant 608 : index
    %c0_108 = arith.constant 0 : index
    %305 = vector.load %arg1[%c608, %c0_108] : memref<944x128xf32, #tpu.memory_space<vmem>>, vector<32x64xf32>
    %cst_109 = arith.constant dense<0.000000e+00> : vector<16x64xf32>
    %306 = tpu.matmul %304, %305, %cst_109 {dimension_numbers = #tpu.dot_dimension_numbers<[1], [0], [0], [1], [0, 0, 1, 1], [], []>} : vector<16x32xf32>, vector<32x64xf32>, vector<16x64xf32> -> vector<16x64xf32>
    %c640 = arith.constant 640 : index
    %c0_110 = arith.constant 0 : index
    %307 = vector.load %arg1[%c640, %c0_110] : memref<944x128xf32, #tpu.memory_space<vmem>>, vector<1x64xf32>
    %308 = vector.broadcast %307 : vector<1x64xf32> to vector<16x64xf32>
    %309 = arith.addf %306, %308 : vector<16x64xf32>
    %cst_111 = arith.constant 0.000000e+00 : f32
    %310 = vector.broadcast %cst_111 : f32 to vector<16x64xf32>
    %311 = arith.maximumf %309, %310 : vector<16x64xf32>
    %c648 = arith.constant 648 : index
    %c0_112 = arith.constant 0 : index
    %312 = vector.load %arg1[%c648, %c0_112] : memref<944x128xf32, #tpu.memory_space<vmem>>, vector<64x32xf32>
    %cst_113 = arith.constant dense<0.000000e+00> : vector<16x32xf32>
    %313 = tpu.matmul %311, %312, %cst_113 {dimension_numbers = #tpu.dot_dimension_numbers<[1], [0], [0], [1], [0, 0, 1, 1], [], []>} : vector<16x64xf32>, vector<64x32xf32>, vector<16x32xf32> -> vector<16x32xf32>
    %314 = arith.addf %280, %313 : vector<16x32xf32>
    %c712 = arith.constant 712 : index
    %c0_114 = arith.constant 0 : index
    %315 = vector.load %arg1[%c712, %c0_114] : memref<944x128xf32, #tpu.memory_space<vmem>>, vector<1x32xf32>
    %316 = vector.broadcast %315 : vector<1x32xf32> to vector<16x32xf32>
    %317 = arith.addf %314, %316 : vector<16x32xf32>
    %c720 = arith.constant 720 : index
    %c0_115 = arith.constant 0 : index
    %318 = vector.load %arg1[%c720, %c0_115] : memref<944x128xf32, #tpu.memory_space<vmem>>, vector<1x32xf32>
    %c728 = arith.constant 728 : index
    %c0_116 = arith.constant 0 : index
    %319 = vector.load %arg1[%c728, %c0_116] : memref<944x128xf32, #tpu.memory_space<vmem>>, vector<1x32xf32>
    %cst_117 = arith.constant dense<0.000000e+00> : vector<16xf32>
    %320 = vector.multi_reduction <add>, %317, %cst_117 [1] : vector<16x32xf32> to vector<16xf32>
    %321 = vector.shape_cast %320 : vector<16xf32> to vector<16x1xf32>
    %cst_118 = arith.constant 3.200000e+01 : f32
    %322 = vector.broadcast %cst_118 : f32 to vector<16x1xf32>
    %323 = arith.divf %321, %322 : vector<16x1xf32>
    %324 = vector.broadcast %323 : vector<16x1xf32> to vector<16x32xf32>
    %325 = arith.subf %317, %324 : vector<16x32xf32>
    %326 = arith.mulf %325, %325 : vector<16x32xf32>
    %cst_119 = arith.constant dense<0.000000e+00> : vector<16xf32>
    %327 = vector.multi_reduction <add>, %326, %cst_119 [1] : vector<16x32xf32> to vector<16xf32>
    %328 = vector.shape_cast %327 : vector<16xf32> to vector<16x1xf32>
    %cst_120 = arith.constant 3.100000e+01 : f32
    %329 = vector.broadcast %cst_120 : f32 to vector<16x1xf32>
    %330 = arith.divf %328, %329 : vector<16x1xf32>
    %331 = math.sqrt %330 : vector<16x1xf32>
    %332 = vector.broadcast %323 : vector<16x1xf32> to vector<16x32xf32>
    %333 = arith.subf %317, %332 : vector<16x32xf32>
    %334 = vector.broadcast %318 : vector<1x32xf32> to vector<16x32xf32>
    %335 = arith.mulf %334, %333 : vector<16x32xf32>
    %cst_121 = arith.constant 9.99999997E-7 : f32
    %336 = vector.broadcast %cst_121 : f32 to vector<16x1xf32>
    %337 = arith.addf %331, %336 : vector<16x1xf32>
    %338 = vector.broadcast %337 : vector<16x1xf32> to vector<16x32xf32>
    %339 = arith.divf %335, %338 : vector<16x32xf32>
    %340 = vector.broadcast %319 : vector<1x32xf32> to vector<16x32xf32>
    %341 = arith.addf %339, %340 : vector<16x32xf32>
    %c0_122 = arith.constant 0 : index
    %c0_123 = arith.constant 0 : index
    %342 = vector.load %arg2[%c0_122, %c0_123] : memref<16x32xf32, #tpu.memory_space<vmem>>, vector<16x32xf32>
    tpu.vector_store %arg2[%c0_122, %c0_123], %341 {strides = array<i32>} : memref<16x32xf32, #tpu.memory_space<vmem>>, vector<16x32xf32>,
    return
  }
}

</mosaic_0001>

<bundles_post_ra>
// kernel: tpu_custom_call.1
= control target key start
LH: loop header
LB: loop body
LE: loop exit
PB: predicated region body
PF: predicated region fallthrough
CT: control target
= control target key end

     0   :  { %7 = vsyncpa [#allocation3], 0  ;;  %s5208_s0 = inlined_call_operand.hbm [shape: f32[64,64], index: 0, kind: input, shape index: {}]   ;;  %s5209_s1 = inlined_call_operand.hbm [shape: f32[944,128], index: 1, kind: input, shape index: {}]   ;;  %s5210_s2 = inlined_call_operand.hbm [shape: f32[16,32], index: 2, kind: output, shape index: {}]  }
   0x1   :  { %8 = vsyncpa [#allocation6], 0 }
   0x2   :  { %9 = vsyncpa [#allocation4], 0  ;;  %s4568_s9 = smov [#allocation2]   ;;  %s4496_s13 = scalar_lea.hbm %s5208_s0, 1024 }
   0x3   :  { %s15_s10 = sshll.u32 %s4568_s9, 4  ;;  %p4497_p0 = scmp.ne.s32.totalorder %s5208_s0, %s4496_s13  ;;  %s16_s10 = int_to_ptr.vmem [resolvable:$true] %s15_s10 }
   0x4   :  { %p4500_p1 = scmp.lt.u32.totalorder %s4496_s13, %s5208_s0 }
   0x6   :  { %p4502_p2 = pnand %p4500_p1, %p4497_p0 }
   0x8   :  { %4505 = shalt.err (!%p4502_p2)
}
   0x9   :  { %s4506_s18 = scalar_lea.vmem %s16_s10, 1024  ;;  %p4511_p4 = scmp.lt.s32.totalorder %s16_s10, %s16_s10 }
   0xa   :  { %p4507_p3 = scmp.ne.s32.totalorder %s16_s10, %s4506_s18  ;;  %p4512_p5 = scmp.lt.s32.totalorder %s4506_s18, %s4506_s18 }
   0xc   :  { %p4513_p6 = por %p4512_p5, %p4511_p4 }
   0xe   :  { %p4514_p7 = pnand %p4513_p6, %p4507_p3 }
  0x10   :  { %4517 = shalt.err (!%p4514_p7)
}
  0x11   :  { %s4569_s19 = smov 128   ;;  %s4570_s20 = smov 8  }
  0x12   :  { %21 = dma.hbm_to_vmem [thread:$0]  %s5208_s0, 1024, %s16_s10, [#allocation3], %s4569_s19, %s4569_s19, %s4570_s20  }
  0x13   :  { %s4571_s23 = smov [#allocation5]   ;;  %s4518_s27 = scalar_lea.hbm %s5209_s1, 15104 }
  0x14   :  { %s27_s24 = sshll.u32 %s4571_s23, 4  ;;  %p4519_p8 = scmp.ne.s32.totalorder %s5209_s1, %s4518_s27  ;;  %s28_s24 = int_to_ptr.vmem [resolvable:$true] %s27_s24 }
  0x15   :  { %p4522_p9 = scmp.lt.u32.totalorder %s4518_s27, %s5209_s1 }
  0x17   :  { %p4524_p10 = pnand %p4522_p9, %p4519_p8 }
  0x19   :  { %4527 = shalt.err (!%p4524_p10)
}
  0x1a   :  { %s4528_s4 = scalar_lea.vmem %s28_s24, 15104  ;;  %p4533_p12 = scmp.lt.s32.totalorder %s28_s24, %s28_s24 }
  0x1b   :  { %p4529_p11 = scmp.ne.s32.totalorder %s28_s24, %s4528_s4  ;;  %p4534_p13 = scmp.lt.s32.totalorder %s4528_s4, %s4528_s4 }
  0x1d   :  { %p4535_p0 = por %p4534_p13, %p4533_p12 }
  0x1f   :  { %p4536_p1 = pnand %p4535_p0, %p4529_p11 }
  0x21   :  { %4539 = shalt.err (!%p4536_p1)
}
  0x22   :  { %33 = dma.hbm_to_vmem [thread:$0]  %s5209_s1, 15104, %s28_s24, [#allocation6], %s4569_s19, %s4569_s19, %s4570_s20  }
  0x23   :  { %4562 = dma.done.wait [#allocation3], 1024  }
  0x24   :  { %4563 = vsyncadd [#allocation3], 4294966272 }
  0x25   :  { %4564 = dma.done.wait [#allocation6], 15104  }
  0x26   :  { %4565 = vsyncadd [#allocation6], 4294952192  ;;  %vm76_vm0 = vcmask 261120   ;;  %v4621_v0 = vld [vmem:[#allocation2] sm:$0xff]  ;;  %v4623_v1 = vld [vmem:[#allocation2 + $0x8] sm:$0xff]  ;;  %s4572_s1 = smov 96  }
  0x27   :  { %v77_v2 = vsel %vm76_vm0, %v4621_v0, 0.0  ;;  %v80_v3 = vsel %vm76_vm0, %v4623_v1, 0.0  ;;  %v131_v14 = vld [vmem:[#allocation5] sm:$0xff]  ;;  %v132_v15 = vld [vmem:[#allocation5 + $0x8] sm:$0xff]  ;;  %v133_v16 = vld [vmem:[#allocation5 + $0x10] sm:$0xff]  ;;  %s4573_s6 = smov 32  }
  0x28   :  { %78 = vadd.xlane.f32.xlu0 %v77_v2  ;;  %v3952_v17 = vpack.c.bf16 %v132_v15, %v131_v14  ;;  %v134_v18 = vld [vmem:[#allocation5 + $0x18] sm:$0xff]  ;;  %v3230_v36 = vld [vmem:[#allocation5 + $0xc8] ss:$0 sm:$0xff]  ;;  %v3231_v39 = vld [vmem:[#allocation5 + $0xd0] ss:$0 sm:$0xff]  ;;  %vm294_vm5 = vcmask 523264  }
  0x29   :  { %v3956_v19 = vpack.c.bf16 %v134_v18, %v133_v16  ;;  %v3232_v46 = vld [vmem:[#allocation5 + $0x20] ss:$0 sm:$0xff]  ;;  %v4647_v51 = vld [vmem:[#allocation5 + $0x2f8] sm:$0xff]  ;;  %v4649_v53 = vld [vmem:[#allocation5 + $0x308] sm:$0xff]  ;;  %s4574_s7 = smov 64   ;;  %s4575_s8 = smov [#allocation7]  }
  0x2a   :  { %3953 = vmatprep.subr.bf16.mxu1 %v3952_v17  ;;  %v4653_v55 = vld [vmem:[#allocation5 + $0x2f0] sm:$0xff]  ;;  %v4655_v56 = vld [vmem:[#allocation5 + $0x300] sm:$0xff]  ;;  %vm4669_vm6 = vmpackc.low %vm294_vm5, %vm294_vm5  ;;  %s3217_s9 = sshll.u32 %s4575_s8, 4  ;;  %s3218_s9 = int_to_ptr.vmem [resolvable:$true] %s3217_s9 }
  0x2b   :  { %3955 = vmatpush3.bf16.msra.mxu1 %v3952_v17  ;;  %v4660_v60 = vld [vmem:[#allocation5 + $0x2e0] sm:$0xff]  ;;  %s4540_s10 = scalar_lea.vmem %s3218_s9, 256  ;;  %p4545_p3 = scmp.lt.s32.totalorder %s3218_s9, %s3218_s9 }
  0x2c   :  { %81 = vadd.xlane.f32.xlu0 %v80_v3  ;;  %3957 = vmatprep.subr.bf16.mxu1 %v3956_v19  ;;  %v4689_v14 = vld [vmem:[#allocation5 + $0x320] sm:$0xff]  ;;  %p4541_p2 = scmp.ne.s32.totalorder %s3218_s9, %s4540_s10  ;;  %p4546_p4 = scmp.lt.s32.totalorder %s4540_s10, %s4540_s10 }
  0x2e   :  { %p4547_p5 = por %p4546_p4, %p4545_p3 }
  0x2f   :  { %3959 = vmatpush3.bf16.msra.mxu1 %v3956_v19  ;;  %v4703_v19 = vld [vmem:[#allocation5 + $0x2e8] sm:$0xff] }
  0x30   :  { %p4548_p6 = pnand %p4547_p5, %p4541_p2 }
  0xb5   :  { %v79_v4 = vpop.xlane.xlu0 %78 }
  0xb6   :  { %v84_v5 = vmul.f32 0.03125, %v79_v4 }
  0xb8   :  { %v86_v6 = vsub.f32 %v4621_v0, %v84_v5 }
  0xb9   :  { %v82_v7 = vpop.xlane.xlu0 %81 }
  0xba   :  { %v85_v8 = vmul.f32 0.03125, %v82_v7  ;;  %v88_v9 = vmul.f32 %v86_v6, %v86_v6  ;;  %v117_v37 = vmul.f32 %v3230_v36, %v86_v6 }
  0xbc   :  { %v87_v10 = vsub.f32 %v4623_v1, %v85_v8  ;;  %v90_v11 = vsel %vm76_vm0, %v88_v9, 0.0  ;;  %v4677_v8 = vld [vmem:[#allocation5 + $0x318] sm:$0xff]  ;;  %v4679_v9 = vld [vmem:[#allocation5 + $0x310] sm:$0xff] }
  0xbd   :  { %91 = vadd.xlane.f32.xlu1 %v90_v11 }
  0xbe   :  { %v89_v12 = vmul.f32 %v87_v10, %v87_v10  ;;  %v118_v41 = vmul.f32 %v3230_v36, %v87_v10  ;;  %v4719_v36 = vld [vmem:[#allocation5 + $0x348] sm:$0xff] }
  0xc0   :  { %v93_v13 = vsel %vm76_vm0, %v89_v12, 0.0 }
  0xc1   :  { %94 = vadd.xlane.f32.xlu1 %v93_v13  ;;  %v4687_v13 = vld [vmem:[#allocation5 + $0x328] sm:$0xff] }
 0x14a   :  { %v92_v20 = vpop.xlane.xlu1 %91 }
 0x14b   :  { %v97_v21 = vmul.f32 0.032258064, %v92_v20 }
 0x14d   :  { %4392 = vrsqrt.f32 %v97_v21  ;;  %vm101_vm1 = vcmp.eq.f32.partialorder %v97_v21, inf  ;;  %v104_v26 = vand.u32 2147483648, %v97_v21  ;;  %vm103_vm2 = vcmp.eq.f32.partialorder %v97_v21, 0.0 }
 0x14e   :  { %v95_v22 = vpop.xlane.xlu1 %94 }
 0x14f   :  { %v98_v23 = vmul.f32 0.032258064, %v95_v22  ;;  %v45_v22 = vld [vmem:[#allocation2 + $0x28] sm:$0xff] }
 0x151   :  { %4394 = vrsqrt.f32 %v98_v23  ;;  %vm108_vm3 = vcmp.eq.f32.partialorder %v98_v23, inf  ;;  %v111_v32 = vand.u32 2147483648, %v98_v23  ;;  %vm110_vm4 = vcmp.eq.f32.partialorder %v98_v23, 0.0 }
 0x157   :  { %v4393_v24 = vpop.eup %4392 }
 0x158   :  { %v100_v25 = vmul.f32 %v4393_v24, %v97_v21 }
 0x15a   :  { %v102_v27 = vsel %vm101_vm1, %v97_v21, %v100_v25 }
 0x15b   :  { %v4395_v28 = vpop.eup %4394  ;;  %v105_v29 = vsel %vm103_vm2, %v104_v26, %v102_v27 }
 0x15c   :  { %v107_v30 = vmul.f32 %v4395_v28, %v98_v23  ;;  %v119_v31 = vadd.f32 1e-06, %v105_v29 }
 0x15e   :  { %v109_v33 = vsel %vm108_vm3, %v98_v23, %v107_v30  ;;  %4396 = vrcp.f32 %v119_v31  ;;  %v44_v23 = vld [vmem:[#allocation2 + $0x20] sm:$0xff]  ;;  %v66_v30 = vld [vmem:[#allocation5 + $0x370] sm:$0xff]  ;;  %v67_v31 = vld [vmem:[#allocation5 + $0x378] sm:$0xff] }
 0x15f   :  { %v112_v34 = vsel %vm110_vm4, %v111_v32, %v109_v33  ;;  %v4711_v32 = vld [vmem:[#allocation5 + $0x338] sm:$0xff]  ;;  %v4713_v33 = vpack.c.bf16 %v67_v31, %v66_v30  ;;  %v222_v30 = vld [vmem:[#allocation5 + $0x30] sm:$0xff] }
 0x160   :  { %v120_v35 = vadd.f32 1e-06, %v112_v34  ;;  %v68_v34 = vld [vmem:[#allocation5 + $0x380] sm:$0xff]  ;;  %v223_v31 = vld [vmem:[#allocation5 + $0x38] sm:$0xff] }
 0x161   :  { %3985 = vmatprep.subr.bf16.mxu0 %v4713_v33 }
 0x162   :  { %4398 = vrcp.f32 %v120_v35  ;;  %3987 = vmatpush3.bf16.msra.mxu0 %v4713_v33  ;;  %v69_v35 = vld [vmem:[#allocation5 + $0x388] sm:$0xff] }
 0x168   :  { %v4397_v38 = vpop.eup %4396 }
 0x169   :  { %v122_v40 = vmul.f32 %v4397_v38, %v117_v37  ;;  %v4721_v37 = vpack.c.bf16 %v69_v35, %v68_v34  ;;  %v4723_v38 = vld [vmem:[#allocation5 + $0x330] sm:$0xff]  ;;  %v224_v35 = vld [vmem:[#allocation5 + $0x40] sm:$0xff] }
 0x16b   :  { %v129_v42 = vadd.f32 %v3231_v39, %v122_v40  ;;  %3989 = vmatprep.subr.bf16.mxu0 %v4721_v37  ;;  %v71_v40 = vld [vmem:[#allocation5 + $0x398] sm:$0xff] }
 0x16c   :  { %v4399_v43 = vpop.eup %4398  ;;  %3991 = vmatpush3.bf16.msra.mxu0 %v4721_v37 }
 0x16d   :  { %v124_v44 = vmul.f32 %v4399_v43, %v118_v41  ;;  %3562 = vmatprep.mubr.msk.f32.mxu1 %vm76_vm0, %v129_v42  ;;  %v4729_v41 = vld [vmem:[#allocation5 + $0x358] sm:$0xff]  ;;  %v4735_v43 = vld [vmem:[#allocation5 + $0x340] sm:$0xff] }
 0x16f   :  { %v130_v45 = vadd.f32 %v3231_v39, %v124_v44  ;;  %v70_v39 = vld [vmem:[#allocation5 + $0x390] sm:$0xff]  ;;  %v72_v44 = vld [vmem:[#allocation5 + $0x3a0] sm:$0xff] }
 0x170   :  { %v4731_v42 = vpack.c.bf16 %v71_v40, %v70_v39 }
 0x171   :  { %3563 = vmatmul.mubr.msk.f32.vlgmr.msra.gmra.mrb[0].mxu1 %vm76_vm0, %v130_v45  ;;  %v73_v45 = vld [vmem:[#allocation5 + $0x3a8] sm:$0xff] }
 0x172   :  { %3993 = vmatprep.subr.bf16.mxu0 %v4731_v42 }
 0x173   :  { %3995 = vmatpush3.bf16.msra.mxu0 %v4731_v42 }
 0x244   :  { %v3564_v47 = vpop.f32.mrb[0].mxu1 }
 0x245   :  { %v4635_v48 = vadd.f32 %v3564_v47, %v3232_v46  ;;  %v212_v49 = vpop.f32.mrb[1].mxu1  ;;  %v4743_v47 = vpack.c.bf16 %v73_v45, %v72_v44 }
 0x246   :  { %v4637_v50 = vadd.f32 %v3232_v46, %v212_v49  ;;  %v4741_v46 = vld [vmem:[#allocation5 + $0x368] sm:$0xff]  ;;  %v4747_v49 = vld [vmem:[#allocation5 + $0x350] sm:$0xff] }
 0x247   :  { %240 = vrot.lane.b32.xlu1 %v4635_v48, %s4572_s1  ;;  %3997 = vmatprep.subr.bf16.mxu0 %v4743_v47 }
 0x248   :  { %238 = vrot.lane.b32.xlu0 %v4637_v50, %s4572_s1  ;;  %3999 = vmatpush3.bf16.msra.mxu0 %v4743_v47 }
 0x24b   :  { %228 = vrot.lane.b32.xlu1 %v4637_v50, %s4573_s6 }
 0x24f   :  { %230 = vrot.lane.b32.xlu1 %v4635_v48, %s4573_s6 }
 0x2b9   :  { %v241_v52 = vpop.permute.xlu1 %240 }
 0x2ba   :  { %v245_v54 = vsel %vm76_vm0, %v241_v52, %v4635_v48  ;;  %v239_v57 = vpop.permute.xlu0 %238  ;;  %v4755_v52 = vld [vmem:[#allocation5 + $0x360] sm:$0xff] }
 0x2bb   :  { %v247_v58 = vmul.f32 %v245_v54, %v4647_v51  ;;  %v244_v59 = vsel %vm76_vm0, %v239_v57, %v4637_v50  ;;  %v249_v61 = vmul.f32 %v245_v54, %v4649_v53  ;;  %v251_v10 = vmul.f32 %v245_v54, %v4677_v8 }
 0x2bc   :  { %v246_v62 = vmul.f32 %v244_v59, %v4653_v55  ;;  %v248_v63 = vmul.f32 %v244_v59, %v4655_v56  ;;  %v250_v11 = vmul.f32 %v244_v59, %v4679_v9  ;;  %v253_v15 = vmul.f32 %v245_v54, %v4687_v13 }
 0x2bd   :  { %v229_v2 = vpop.permute.xlu1 %228  ;;  %v252_v16 = vmul.f32 %v244_v59, %v4689_v14 }
 0x2be   :  { %v234_v3 = vsel %vm76_vm0, %v4637_v50, %v229_v2  ;;  %v3960_v6 = vpack.c.bf16 %v247_v58, %v246_v62  ;;  %v3966_v7 = vpack.c.bf16 %v249_v61, %v248_v63  ;;  %v3972_v12 = vpack.c.bf16 %v251_v10, %v250_v11 }
 0x2bf   :  { %v236_v5 = vmul.f32 %v234_v3, %v4660_v60  ;;  %v3978_v17 = vpack.c.bf16 %v253_v15, %v252_v16 }
 0x2c0   :  { %3962 = vmatprep.subr.msk.bf16.mxu1 %vm4669_vm6, %v3960_v6 }
 0x2c1   :  { %3581 = vmatprep.mubr.msk.f32.mxu1 %vm294_vm5, %v236_v5  ;;  %3965 = vmatpush3.bf16.xpose.msk.msra.mxu1 %vm4669_vm6, %v3960_v6  ;;  %v231_v18 = vpop.permute.xlu1 %230 }
 0x2c2   :  { %3968 = vmatprep.subr.msk.bf16.mxu1 %vm4669_vm6, %v3966_v7  ;;  %v235_v20 = vsel %vm76_vm0, %v4635_v48, %v231_v18 }
 0x2c3   :  { %v237_v21 = vmul.f32 %v235_v20, %v4703_v19 }
 0x2c9   :  { %3971 = vmatpush3.bf16.xpose.msk.msra.mxu1 %vm4669_vm6, %v3966_v7 }
 0x2ca   :  { %3974 = vmatprep.subr.msk.bf16.mxu1 %vm4669_vm6, %v3972_v12 }
 0x2d1   :  { %3977 = vmatpush3.bf16.xpose.msk.msra.mxu1 %vm4669_vm6, %v3972_v12 }
 0x2d2   :  { %3980 = vmatprep.subr.msk.bf16.mxu1 %vm4669_vm6, %v3978_v17 }
 0x2d9   :  { %3983 = vmatpush3.bf16.xpose.msk.msra.mxu1 %vm4669_vm6, %v3978_v17 }
 0x2e0   :  { %3582 = vmatmul.mubr.msk.f32.vlgmr.msra.gmra.mrb[2].mxu1 %vm294_vm5, %v237_v21 }
 0x3b3   :  { %v3583_v24 = vpop.f32.mrb[2].mxu1 }
 0x3b4   :  { %v397_v25 = vadd.f32 %v3583_v24, %v45_v22  ;;  %v391_v26 = vpop.f32.mrb[3].mxu1 }
 0x3b5   :  { %v392_v27 = vadd.f32 %v391_v26, %v44_v23 }
 0x3b6   :  { %v403_v28 = vsel %vm294_vm5, %v397_v25, -inf }
 0x3b7   :  { %404 = vmax.xlane.f32.xlu1 %v403_v28  ;;  %v400_v29 = vsel %vm294_vm5, %v392_v27, -inf }
 0x3b8   :  { %401 = vmax.xlane.f32.xlu0 %v400_v29  ;;  %v221_v29 = vld [vmem:[#allocation5 + $0x28] sm:$0xff] }
 0x3b9   :  { %v4016_v34 = vpack.c.bf16 %v222_v30, %v221_v29 }
 0x3bb   :  { %4017 = vmatprep.subr.bf16.mxu1 %v4016_v34 }
 0x3bc   :  { %4019 = vmatpush3.bf16.msra.mxu1 %v4016_v34  ;;  %v3249_v34 = vld [vmem:[#allocation5 + $0x48] ss:$0 sm:$0xff] }
 0x3c8   :  { %264 = vrot.lane.b32.xlu1 %v4711_v32, %s4574_s7 }
 0x3cc   :  { %268 = vrot.lane.b32.xlu1 %v4719_v36, %s4574_s7 }
 0x3ce   :  { %262 = vrot.lane.b32.xlu0 %v4723_v38, %s4574_s7 }
 0x3d0   :  { %272 = vrot.lane.b32.xlu1 %v4729_v41, %s4574_s7 }
 0x3d2   :  { %266 = vrot.lane.b32.xlu0 %v4735_v43, %s4574_s7 }
 0x3d4   :  { %276 = vrot.lane.b32.xlu1 %v4741_v46, %s4574_s7 }
 0x3d6   :  { %270 = vrot.lane.b32.xlu0 %v4747_v49, %s4574_s7 }
 0x3da   :  { %274 = vrot.lane.b32.xlu0 %v4755_v52, %s4574_s7 }
 0x444   :  { %v405_v54 = vpop.xlane.xlu1 %404 }
 0x445   :  { %v407_v57 = vsub.f32 %v397_v25, %v405_v54  ;;  %v402_v58 = vpop.xlane.xlu0 %401 }
 0x446   :  { %v406_v59 = vsub.f32 %v392_v27, %v402_v58 }
 0x447   :  { %v410_v61 = vmul.f32 1.442695, %v407_v57 }
 0x448   :  { %v408_v62 = vmul.f32 1.442695, %v406_v59  ;;  %v4759_v63 = vpop.permute.xlu1 %264 }
 0x449   :  { %v287_v2 = vmul.f32 %v4759_v63, %v4635_v48  ;;  %v4763_v3 = vpop.permute.xlu0 %262 }
 0x44a   :  { %4400 = vpow2.f32 %v408_v62  ;;  %v286_v5 = vmul.f32 %v4763_v3, %v4637_v50 }
 0x44b   :  { %4402 = vpow2.f32 %v410_v61 }
 0x44c   :  { %v4312_v6 = vpack.i.bf16 %v287_v2, %v286_v5  ;;  %v4767_v7 = vpop.permute.xlu1 %268 }
 0x44d   :  { %v289_v10 = vmul.f32 %v4767_v7, %v4635_v48  ;;  %v4771_v11 = vpop.permute.xlu0 %266 }
 0x44e   :  { %v288_v12 = vmul.f32 %v4771_v11, %v4637_v50  ;;  %4313 = vrot.lane.b32.xlu0 %v4312_v6, %s4574_s7 }
 0x450   :  { %v4317_v15 = vpack.i.bf16 %v289_v10, %v288_v12  ;;  %v4776_v16 = vpop.permute.xlu1 %272 }
 0x451   :  { %v291_v17 = vmul.f32 %v4776_v16, %v4635_v48  ;;  %v4780_v18 = vpop.permute.xlu0 %270 }
 0x452   :  { %v290_v20 = vmul.f32 %v4780_v18, %v4637_v50  ;;  %4318 = vrot.lane.b32.xlu1 %v4317_v15, %s4574_s7 }
 0x454   :  { %v4401_v21 = vpop.eup %4400  ;;  %v4322_v22 = vpack.i.bf16 %v291_v17, %v290_v20  ;;  %v4785_v23 = vpop.permute.xlu1 %276 }
 0x455   :  { %v4403_v24 = vpop.eup %4402  ;;  %v293_v25 = vmul.f32 %v4785_v23, %v4635_v48  ;;  %3600 = vmatprep.mubr.msk.f32.mxu0 %vm294_vm5, %v4401_v21  ;;  %v4790_v26 = vpop.permute.xlu0 %274  ;;  %v4020_v48 = vpack.c.bf16 %v224_v35, %v223_v31 }
 0x456   :  { %v292_v27 = vmul.f32 %v4790_v26, %v4637_v50  ;;  %3601 = vmatmul.mubr.msk.f32.vlgmr.msra.gmra.mrb[0].mxu0 %vm294_vm5, %v4403_v24  ;;  %4323 = vrot.lane.b32.xlu0 %v4322_v22, %s4574_s7 }
 0x457   :  { %4021 = vmatprep.subr.bf16.mxu1 %v4020_v48 }
 0x458   :  { %v4327_v28 = vpack.i.bf16 %v293_v25, %v292_v27  ;;  %4023 = vmatpush3.bf16.msra.mxu1 %v4020_v48 }
 0x45a   :  { %4328 = vrot.lane.b32.xlu1 %v4327_v28, %s4574_s7 }
 0x4c0   :  { %v4314_v39 = vpop.permute.xlu0 %4313 }
 0x4c1   :  { %v4316_v40 = vunpack.i.h.bf16 %v4314_v39  ;;  %v4315_v44 = vunpack.i.l.bf16 %v4314_v39 }
 0x4c3   :  { %v4000_v50 = vpack.c.bf16 %v4316_v40, %v4315_v44 }
 0x4c4   :  { %v4319_v45 = vpop.permute.xlu1 %4318 }
 0x4c5   :  { %v4321_v54 = vunpack.i.h.bf16 %v4319_v45  ;;  %v4320_v57 = vunpack.i.l.bf16 %v4319_v45  ;;  %4001 = vmatprep.subr.bf16.mxu0 %v4000_v50  ;;  %v843_v45 = vld [vmem:[#allocation5 + $0x78] sm:$0xff] }
 0x4c6   :  { %4003 = vmatpush3.bf16.msra.mxu0 %v4000_v50 }
 0x4c7   :  { %v4004_v58 = vpack.c.bf16 %v4321_v54, %v4320_v57  ;;  %v844_v54 = vld [vmem:[#allocation5 + $0x80] sm:$0xff] }
 0x4c8   :  { %v4324_v59 = vpop.permute.xlu0 %4323  ;;  %v4032_v57 = vpack.c.bf16 %v844_v54, %v843_v45 }
 0x4c9   :  { %v4326_v61 = vunpack.i.h.bf16 %v4324_v59  ;;  %v4325_v62 = vunpack.i.l.bf16 %v4324_v59  ;;  %4005 = vmatprep.subr.bf16.mxu0 %v4004_v58  ;;  %v846_v59 = vld [vmem:[#allocation5 + $0x90] sm:$0xff] }
 0x4ca   :  { %4007 = vmatpush3.bf16.msra.mxu0 %v4004_v58  ;;  %4033 = vmatprep.subr.bf16.mxu1 %v4032_v57  ;;  %v845_v58 = vld [vmem:[#allocation5 + $0x88] sm:$0xff] }
 0x4cb   :  { %v4008_v2 = vpack.c.bf16 %v4326_v61, %v4325_v62  ;;  %v42_v61 = vld [vmem:[#allocation2 + $0x10] sm:$0xff] }
 0x4cc   :  { %v4329_v5 = vpop.permute.xlu1 %4328 }
 0x4cd   :  { %v4331_v6 = vunpack.i.h.bf16 %v4329_v5  ;;  %v4330_v10 = vunpack.i.l.bf16 %v4329_v5  ;;  %4009 = vmatprep.subr.bf16.mxu0 %v4008_v2 }
 0x4ce   :  { %4011 = vmatpush3.bf16.msra.mxu0 %v4008_v2 }
 0x4cf   :  { %v4012_v12 = vpack.c.bf16 %v4331_v6, %v4330_v10 }
 0x4d1   :  { %4013 = vmatprep.subr.bf16.mxu0 %v4012_v12 }
 0x4d2   :  { %4015 = vmatpush3.bf16.msra.mxu0 %v4012_v12 }
 0x529   :  { %v3602_v15 = vpop.f32.mrb[0].mxu0 }
 0x52a   :  { %v494_v17 = vmax.f32 %v3602_v15, 1e-30  ;;  %v484_v20 = vpop.f32.mrb[1].mxu0 }
 0x52b   :  { %v493_v22 = vmax.f32 %v484_v20, 1e-30 }
 0x52c   :  { %4404 = vrcp.f32 %v494_v17 }
 0x52d   :  { %4406 = vrcp.f32 %v493_v22 }
 0x536   :  { %v4405_v25 = vpop.eup %4404 }
 0x537   :  { %v4407_v27 = vpop.eup %4406  ;;  %v498_v29 = vmul.f32 %v4405_v25, %v4403_v24  ;;  %v753_v25 = vld [vmem:[#allocation5 + $0x50] sm:$0xff] }
 0x538   :  { %v496_v28 = vmul.f32 %v4407_v27, %v4401_v21  ;;  %v754_v27 = vld [vmem:[#allocation5 + $0x58] sm:$0xff] }
 0x53a   :  { %3619 = vmatprep.mubr.msk.f32.mxu0 %vm294_vm5, %v496_v28  ;;  %v755_v28 = vld [vmem:[#allocation5 + $0x60] sm:$0xff] }
 0x53b   :  { %3620 = vmatmul.mubr.msk.f32.vlgmr.msra.gmra.mrb[2].mxu0 %vm294_vm5, %v498_v29  ;;  %v4024_v29 = vpack.c.bf16 %v754_v27, %v753_v25  ;;  %v3253_v27 = vld [vmem:[#allocation5 + $0xe0] ss:$0 sm:$0xff] }
 0x53d   :  { %4025 = vmatprep.subr.bf16.mxu0 %v4024_v29 }
 0x53e   :  { %4027 = vmatpush3.bf16.msra.mxu0 %v4024_v29 }
 0x60e   :  { %v3621_v30 = vpop.f32.mrb[2].mxu0 }
 0x60f   :  { %v603_v31 = vpop.f32.mrb[3].mxu0 }
 0x610   :  { %3630 = vmatprep.mubr.msk.f32.mxu1 %vm76_vm0, %v603_v31 }
 0x611   :  { %3631 = vmatmul.mubr.msk.f32.vlgmr.msra.gmra.mrb[4].mxu1 %vm76_vm0, %v3621_v30  ;;  %v756_v30 = vld [vmem:[#allocation5 + $0x68] sm:$0xff] }
 0x612   :  { %4035 = vmatpush3.bf16.msra.mxu1 %v4032_v57  ;;  %3652 = vmatprep.mubr.msk.f32.mxu1 %vm76_vm0, %v42_v61  ;;  %v4028_v31 = vpack.c.bf16 %v756_v30, %v755_v28 }
 0x614   :  { %4029 = vmatprep.subr.bf16.mxu0 %v4028_v31 }
 0x615   :  { %4031 = vmatpush3.bf16.msra.mxu0 %v4028_v31 }
 0x6e4   :  { %v3632_v35 = vpop.f32.mrb[4].mxu1 }
 0x6e5   :  { %v694_v48 = vadd.f32 %v3632_v35, %v3249_v34  ;;  %v688_v39 = vpop.f32.mrb[5].mxu1 }
 0x6e6   :  { %v689_v40 = vadd.f32 %v3249_v34, %v688_v39  ;;  %v3257_v34 = vld [vmem:[#allocation5 + $0x98] ss:$0 sm:$0xff] }
 0x6e7   :  { %v4802_v44 = vadd.f32 %v694_v48, %v4623_v1  ;;  %v4036_v1 = vpack.c.bf16 %v846_v59, %v845_v58 }
 0x6e8   :  { %v4805_v21 = vadd.f32 %v689_v40, %v4621_v0  ;;  %v43_v0 = vld [vmem:[#allocation2 + $0x18] sm:$0xff] }
 0x6e9   :  { %v704_v24 = vsel %vm76_vm0, %v4802_v44, 0.0  ;;  %4037 = vmatprep.subr.bf16.mxu1 %v4036_v1 }
 0x6ea   :  { %705 = vadd.xlane.f32.xlu1 %v704_v24  ;;  %v701_v50 = vsel %vm76_vm0, %v4805_v21, 0.0  ;;  %4039 = vmatpush3.bf16.msra.mxu1 %v4036_v1 }
 0x6eb   :  { %702 = vadd.xlane.f32.xlu0 %v701_v50  ;;  %4065 = vmatprep.subr.bf16.mxu1 %v4713_v33 }
 0x6ed   :  { %3653 = vmatmul.mubr.msk.f32.vlgmr.msra.gmra.mrb[6].mxu1 %vm76_vm0, %v43_v0 }
 0x6ee   :  { %4067 = vmatpush3.bf16.msra.mxu1 %v4713_v33 }
 0x6ef   :  { %4069 = vmatprep.subr.bf16.mxu1 %v4721_v37 }
 0x6f2   :  { %4071 = vmatpush3.bf16.msra.mxu1 %v4721_v37 }
 0x6f3   :  { %4073 = vmatprep.subr.bf16.mxu1 %v4731_v42 }
 0x6f6   :  { %4075 = vmatpush3.bf16.msra.mxu1 %v4731_v42 }
 0x6f7   :  { %4077 = vmatprep.subr.bf16.mxu1 %v4743_v47 }
 0x6fa   :  { %4079 = vmatpush3.bf16.msra.mxu1 %v4743_v47 }
 0x777   :  { %v706_v62 = vpop.xlane.xlu1 %705 }
 0x778   :  { %v708_v2 = vmul.f32 0.03125, %v706_v62  ;;  %v703_v5 = vpop.xlane.xlu0 %702 }
 0x779   :  { %v707_v6 = vmul.f32 0.03125, %v703_v5 }
 0x77a   :  { %v710_v10 = vsub.f32 %v4802_v44, %v708_v2 }
 0x77b   :  { %v709_v12 = vsub.f32 %v4805_v21, %v707_v6 }
 0x77c   :  { %v712_v20 = vmul.f32 %v710_v10, %v710_v10 }
 0x77d   :  { %v711_v15 = vmul.f32 %v709_v12, %v709_v12 }
 0x77e   :  { %v716_v22 = vsel %vm76_vm0, %v712_v20, 0.0  ;;  %v3252_v20 = vld [vmem:[#allocation5 + $0xd8] ss:$0 sm:$0xff] }
 0x77f   :  { %v713_v17 = vsel %vm76_vm0, %v711_v15, 0.0  ;;  %v740_v29 = vmul.f32 %v3252_v20, %v710_v10 }
 0x780   :  { %714 = vadd.xlane.f32.xlu0 %v713_v17 }
 0x784   :  { %717 = vadd.xlane.f32.xlu0 %v716_v22  ;;  %v739_v22 = vmul.f32 %v3252_v20, %v709_v12  ;;  %v47_v20 = vld [vmem:[#allocation2 + $0x38] sm:$0xff] }
 0x7c0   :  { %v3654_v35 = vpop.f32.mrb[6].mxu1 }
 0x7c1   :  { %v4825_v48 = vadd.f32 %v3654_v35, %v3257_v34  ;;  %v924_v39 = vpop.f32.mrb[7].mxu1 }
 0x7c2   :  { %v4827_v40 = vadd.f32 %v3257_v34, %v924_v39 }
 0x7c3   :  { %954 = vrot.lane.b32.xlu1 %v4825_v48, %s4573_s6 }
 0x7c4   :  { %952 = vrot.lane.b32.xlu0 %v4827_v40, %s4573_s6 }
 0x80d   :  { %v715_v24 = vpop.xlane.xlu0 %714 }
 0x80e   :  { %v719_v50 = vmul.f32 0.032258064, %v715_v24 }
 0x810   :  { %4408 = vrsqrt.f32 %v719_v50  ;;  %vm723_vm7 = vcmp.eq.f32.partialorder %v719_v50, inf  ;;  %v726_v59 = vand.u32 2147483648, %v719_v50  ;;  %vm725_vm8 = vcmp.eq.f32.partialorder %v719_v50, 0.0 }
 0x811   :  { %v718_v45 = vpop.xlane.xlu0 %717 }
 0x812   :  { %v720_v54 = vmul.f32 0.032258064, %v718_v45 }
 0x814   :  { %4410 = vrsqrt.f32 %v720_v54  ;;  %vm730_vm9 = vcmp.eq.f32.partialorder %v720_v54, inf  ;;  %v733_v5 = vand.u32 2147483648, %v720_v54  ;;  %vm732_vm10 = vcmp.eq.f32.partialorder %v720_v54, 0.0 }
 0x81a   :  { %v4409_v57 = vpop.eup %4408 }
 0x81b   :  { %v722_v58 = vmul.f32 %v4409_v57, %v719_v50 }
 0x81d   :  { %v724_v1 = vsel %vm723_vm7, %v719_v50, %v722_v58 }
 0x81e   :  { %v4411_v61 = vpop.eup %4410  ;;  %v727_v0 = vsel %vm725_vm8, %v726_v59, %v724_v1 }
 0x81f   :  { %v729_v62 = vmul.f32 %v4411_v61, %v720_v54  ;;  %v741_v2 = vadd.f32 1e-06, %v727_v0 }
 0x821   :  { %v731_v6 = vsel %vm730_vm9, %v720_v54, %v729_v62  ;;  %4412 = vrcp.f32 %v741_v2 }
 0x822   :  { %v734_v15 = vsel %vm732_vm10, %v733_v5, %v731_v6 }
 0x823   :  { %v742_v17 = vadd.f32 1e-06, %v734_v15 }
 0x825   :  { %4414 = vrcp.f32 %v742_v17 }
 0x82b   :  { %v4413_v25 = vpop.eup %4412 }
 0x82c   :  { %v744_v28 = vmul.f32 %v4413_v25, %v739_v22  ;;  %v46_v22 = vld [vmem:[#allocation2 + $0x30] sm:$0xff] }
 0x82e   :  { %v751_v30 = vadd.f32 %v3253_v27, %v744_v28 }
 0x82f   :  { %v4415_v31 = vpop.eup %4414 }
 0x830   :  { %v746_v34 = vmul.f32 %v4415_v31, %v740_v29  ;;  %3641 = vmatprep.mubr.msk.f32.mxu0 %vm76_vm0, %v751_v30 }
 0x832   :  { %v752_v35 = vadd.f32 %v3253_v27, %v746_v34 }
 0x834   :  { %3642 = vmatmul.mubr.msk.f32.vlgmr.msra.gmra.mrb[4].mxu0 %vm76_vm0, %v752_v35 }
 0x835   :  { %v955_v39 = vpop.permute.xlu1 %954 }
 0x836   :  { %v959_v24 = vsel %vm76_vm0, %v4825_v48, %v955_v39  ;;  %v953_v50 = vpop.permute.xlu0 %952 }
 0x837   :  { %v961_v45 = vmul.f32 %v959_v24, %v4647_v51  ;;  %v963_v12 = vmul.f32 %v959_v24, %v4649_v53  ;;  %v958_v10 = vsel %vm76_vm0, %v4827_v40, %v953_v50  ;;  %v965_v1 = vmul.f32 %v959_v24, %v4677_v8  ;;  %v3254_v8 = vld [vmem:[#allocation5 + $0x70] ss:$0 sm:$0xff] }
 0x838   :  { %v960_v54 = vmul.f32 %v958_v10, %v4653_v55  ;;  %v962_v57 = vmul.f32 %v958_v10, %v4655_v56  ;;  %v964_v51 = vmul.f32 %v958_v10, %v4679_v9  ;;  %v967_v55 = vmul.f32 %v959_v24, %v4687_v13 }
 0x839   :  { %v966_v56 = vmul.f32 %v958_v10, %v4689_v14 }
 0x83a   :  { %v4040_v58 = vpack.c.bf16 %v961_v45, %v960_v54  ;;  %v4046_v59 = vpack.c.bf16 %v963_v12, %v962_v57  ;;  %v4052_v53 = vpack.c.bf16 %v965_v1, %v964_v51 }
 0x83b   :  { %v4058_v61 = vpack.c.bf16 %v967_v55, %v966_v56 }
 0x83c   :  { %4042 = vmatprep.subr.msk.bf16.mxu0 %vm4669_vm6, %v4040_v58 }
 0x83d   :  { %4045 = vmatpush3.bf16.xpose.msk.msra.mxu0 %vm4669_vm6, %v4040_v58 }
 0x83e   :  { %4048 = vmatprep.subr.msk.bf16.mxu0 %vm4669_vm6, %v4046_v59 }
 0x845   :  { %4051 = vmatpush3.bf16.xpose.msk.msra.mxu0 %vm4669_vm6, %v4046_v59 }
 0x846   :  { %4054 = vmatprep.subr.msk.bf16.mxu0 %vm4669_vm6, %v4052_v53 }
 0x84d   :  { %4057 = vmatpush3.bf16.xpose.msk.msra.mxu0 %vm4669_vm6, %v4052_v53 }
 0x84e   :  { %4060 = vmatprep.subr.msk.bf16.mxu0 %vm4669_vm6, %v4058_v61 }
 0x855   :  { %4063 = vmatpush3.bf16.xpose.msk.msra.mxu0 %vm4669_vm6, %v4058_v61 }
 0x907   :  { %v3643_v9 = vpop.f32.mrb[4].mxu0 }
 0x908   :  { %v834_v0 = vpop.f32.mrb[5].mxu0  ;;  %v840_v13 = vadd.f32 %v3643_v9, %v3254_v8  ;;  %v934_v9 = vld [vmem:[#allocation5 + $0xa8] sm:$0xff] }
 0x909   :  { %v835_v62 = vadd.f32 %v3254_v8, %v834_v0  ;;  %v933_v8 = vld [vmem:[#allocation5 + $0xa0] sm:$0xff]  ;;  %v935_v0 = vld [vmem:[#allocation5 + $0xb0] sm:$0xff] }
 0x90b   :  { %940 = vrot.lane.b32.xlu1 %v835_v62, %s4573_s6 }
 0x90f   :  { %942 = vrot.lane.b32.xlu1 %v840_v13, %s4573_s6 }
 0x97d   :  { %v941_v14 = vpop.permute.xlu1 %940 }
 0x97e   :  { %v946_v2 = vsel %vm76_vm0, %v835_v62, %v941_v14  ;;  %v4096_v62 = vpack.c.bf16 %v934_v9, %v933_v8 }
 0x97f   :  { %v948_v5 = vmul.f32 %v946_v2, %v4660_v60 }
 0x980   :  { %4097 = vmatprep.subr.bf16.mxu0 %v4096_v62 }
 0x981   :  { %3671 = vmatprep.mubr.msk.f32.mxu0 %vm294_vm5, %v948_v5  ;;  %v943_v6 = vpop.permute.xlu1 %942 }
 0x982   :  { %v947_v15 = vsel %vm76_vm0, %v840_v13, %v943_v6  ;;  %v936_v13 = vld [vmem:[#allocation5 + $0xb8] sm:$0xff] }
 0x983   :  { %v949_v17 = vmul.f32 %v947_v15, %v4703_v19 }
 0x985   :  { %3672 = vmatmul.mubr.msk.f32.vlgmr.msra.gmra.mrb[6].mxu0 %vm294_vm5, %v949_v17 }
 0x986   :  { %4099 = vmatpush3.bf16.msra.mxu0 %v4096_v62 }
 0xa58   :  { %v3673_v25 = vpop.f32.mrb[6].mxu0 }
 0xa59   :  { %v1102_v27 = vadd.f32 %v3673_v25, %v47_v20  ;;  %v1096_v28 = vpop.f32.mrb[7].mxu0 }
 0xa5a   :  { %v1097_v29 = vadd.f32 %v1096_v28, %v46_v22 }
 0xa5b   :  { %v1108_v30 = vsel %vm294_vm5, %v1102_v27, -inf }
 0xa5c   :  { %1109 = vmax.xlane.f32.xlu1 %v1108_v30  ;;  %v1105_v60 = vsel %vm294_vm5, %v1097_v29, -inf }
 0xa5d   :  { %1106 = vmax.xlane.f32.xlu0 %v1105_v60 }
 0xa6d   :  { %970 = vrot.lane.b32.xlu1 %v4711_v32, %s4573_s6 }
 0xa71   :  { %974 = vrot.lane.b32.xlu1 %v4719_v36, %s4573_s6 }
 0xa73   :  { %968 = vrot.lane.b32.xlu0 %v4723_v38, %s4573_s6 }
 0xa75   :  { %978 = vrot.lane.b32.xlu1 %v4729_v41, %s4573_s6 }
 0xa77   :  { %972 = vrot.lane.b32.xlu0 %v4735_v43, %s4573_s6 }
 0xa79   :  { %982 = vrot.lane.b32.xlu1 %v4741_v46, %s4573_s6 }
 0xa7b   :  { %976 = vrot.lane.b32.xlu0 %v4747_v49, %s4573_s6 }
 0xa7f   :  { %980 = vrot.lane.b32.xlu0 %v4755_v52, %s4573_s6 }
 0xae9   :  { %v1110_v19 = vpop.xlane.xlu1 %1109 }
 0xaea   :  { %v1112_v32 = vsub.f32 %v1102_v27, %v1110_v19  ;;  %v1107_v36 = vpop.xlane.xlu0 %1106 }
 0xaeb   :  { %v1111_v31 = vsub.f32 %v1097_v29, %v1107_v36 }
 0xaec   :  { %v1115_v38 = vmul.f32 1.442695, %v1112_v32 }
 0xaed   :  { %v1113_v34 = vmul.f32 1.442695, %v1111_v31  ;;  %v4889_v35 = vpop.permute.xlu1 %970 }
 0xaee   :  { %v993_v41 = vmul.f32 %v4889_v35, %v4825_v48  ;;  %v4893_v43 = vpop.permute.xlu0 %968 }
 0xaef   :  { %4416 = vpow2.f32 %v1113_v34  ;;  %v992_v46 = vmul.f32 %v4893_v43, %v4827_v40 }
 0xaf0   :  { %4418 = vpow2.f32 %v1115_v38 }
 0xaf1   :  { %v4332_v49 = vpack.i.bf16 %v993_v41, %v992_v46  ;;  %v4897_v52 = vpop.permute.xlu1 %974 }
 0xaf2   :  { %v995_v39 = vmul.f32 %v4897_v52, %v4825_v48  ;;  %v4901_v24 = vpop.permute.xlu0 %972 }
 0xaf3   :  { %v994_v50 = vmul.f32 %v4901_v24, %v4827_v40  ;;  %4333 = vrot.lane.b32.xlu0 %v4332_v49, %s4572_s1 }
 0xaf5   :  { %v4337_v45 = vpack.i.bf16 %v995_v39, %v994_v50  ;;  %v4906_v12 = vpop.permute.xlu1 %978 }
 0xaf6   :  { %v997_v10 = vmul.f32 %v4906_v12, %v4825_v48  ;;  %v4910_v54 = vpop.permute.xlu0 %976 }
 0xaf7   :  { %v996_v57 = vmul.f32 %v4910_v54, %v4827_v40  ;;  %4338 = vrot.lane.b32.xlu1 %v4337_v45, %s4572_s1  ;;  %v3274_v45 = vld [vmem:[#allocation5 + $0xc0] ss:$0 sm:$0xff] }
 0xaf9   :  { %v4417_v58 = vpop.eup %4416  ;;  %v4342_v59 = vpack.i.bf16 %v997_v10, %v996_v57  ;;  %v4915_v1 = vpop.permute.xlu1 %982 }
 0xafa   :  { %v4419_v51 = vpop.eup %4418  ;;  %v999_v53 = vmul.f32 %v4915_v1, %v4825_v48  ;;  %3690 = vmatprep.mubr.msk.f32.mxu1 %vm294_vm5, %v4417_v58  ;;  %v4920_v55 = vpop.permute.xlu0 %980  ;;  %v4100_v48 = vpack.c.bf16 %v936_v13, %v935_v0 }
 0xafb   :  { %v998_v56 = vmul.f32 %v4920_v55, %v4827_v40  ;;  %3691 = vmatmul.mubr.msk.f32.vlgmr.msra.gmra.mrb[8].mxu1 %vm294_vm5, %v4419_v51  ;;  %4343 = vrot.lane.b32.xlu0 %v4342_v59, %s4572_s1 }
 0xafc   :  { %4101 = vmatprep.subr.bf16.mxu0 %v4100_v48 }
 0xafd   :  { %v4347_v61 = vpack.i.bf16 %v999_v53, %v998_v56  ;;  %4103 = vmatpush3.bf16.msra.mxu0 %v4100_v48 }
 0xaff   :  { %4348 = vrot.lane.b32.xlu1 %v4347_v61, %s4572_s1 }
 0xb65   :  { %v4334_v14 = vpop.permute.xlu0 %4333 }
 0xb66   :  { %v4336_v2 = vunpack.i.h.bf16 %v4334_v14  ;;  %v4335_v5 = vunpack.i.l.bf16 %v4334_v14 }
 0xb68   :  { %v4080_v40 = vpack.c.bf16 %v4336_v2, %v4335_v5  ;;  %v1458_v5 = vld [vmem:[#allocation5 + $0xf8] sm:$0xff] }
 0xb69   :  { %v4339_v6 = vpop.permute.xlu1 %4338 }
 0xb6a   :  { %v4341_v15 = vunpack.i.h.bf16 %v4339_v6  ;;  %v4340_v17 = vunpack.i.l.bf16 %v4339_v6  ;;  %4081 = vmatprep.subr.bf16.mxu1 %v4080_v40  ;;  %v1460_v6 = vld [vmem:[#allocation5 + $0x108] sm:$0xff] }
 0xb6b   :  { %4083 = vmatpush3.bf16.msra.mxu1 %v4080_v40  ;;  %v1459_v40 = vld [vmem:[#allocation5 + $0x100] sm:$0xff] }
 0xb6c   :  { %v4084_v20 = vpack.c.bf16 %v4341_v15, %v4340_v17  ;;  %v4104_v15 = vpack.c.bf16 %v1459_v40, %v1458_v5  ;;  %v1461_v17 = vld [vmem:[#allocation5 + $0x110] sm:$0xff] }
 0xb6d   :  { %v4344_v22 = vpop.permute.xlu0 %4343 }
 0xb6e   :  { %v4346_v25 = vunpack.i.h.bf16 %v4344_v22  ;;  %v4345_v27 = vunpack.i.l.bf16 %v4344_v22  ;;  %4085 = vmatprep.subr.bf16.mxu1 %v4084_v20  ;;  %v1550_v22 = vld [vmem:[#allocation5 + $0x120] sm:$0xff] }
 0xb6f   :  { %4087 = vmatpush3.bf16.msra.mxu1 %v4084_v20  ;;  %v4108_v20 = vpack.c.bf16 %v1461_v17, %v1460_v6  ;;  %v1556_v6 = vld [vmem:[#allocation5 + $0x150] sm:$0xff] }
 0xb70   :  { %v4088_v28 = vpack.c.bf16 %v4346_v25, %v4345_v27  ;;  %v1551_v25 = vld [vmem:[#allocation5 + $0x128] sm:$0xff]  ;;  %v1552_v27 = vld [vmem:[#allocation5 + $0x130] sm:$0xff] }
 0xb71   :  { %v4349_v29 = vpop.permute.xlu1 %4348 }
 0xb72   :  { %v4351_v30 = vunpack.i.h.bf16 %v4349_v29  ;;  %v4350_v60 = vunpack.i.l.bf16 %v4349_v29  ;;  %4089 = vmatprep.subr.bf16.mxu1 %v4088_v28  ;;  %v1553_v29 = vld [vmem:[#allocation5 + $0x138] sm:$0xff] }
 0xb73   :  { %4091 = vmatpush3.bf16.msra.mxu1 %v4088_v28  ;;  %v4112_v28 = vpack.c.bf16 %v1551_v25, %v1550_v22 }
 0xb74   :  { %v4092_v19 = vpack.c.bf16 %v4351_v30, %v4350_v60  ;;  %v4116_v30 = vpack.c.bf16 %v1553_v29, %v1552_v27  ;;  %v1554_v60 = vld [vmem:[#allocation5 + $0x140] sm:$0xff] }
 0xb75   :  { %4113 = vmatprep.subr.bf16.mxu0 %v4112_v28 }
 0xb76   :  { %4093 = vmatprep.subr.bf16.mxu1 %v4092_v19 }
 0xb77   :  { %4095 = vmatpush3.bf16.msra.mxu1 %v4092_v19  ;;  %v1555_v19 = vld [vmem:[#allocation5 + $0x148] sm:$0xff] }
 0xb78   :  { %4105 = vmatprep.subr.bf16.mxu1 %v4104_v15 }
 0xbce   :  { %v3692_v32 = vpop.f32.mrb[8].mxu1 }
 0xbcf   :  { %v1199_v36 = vmax.f32 %v3692_v32, 1e-30  ;;  %v1189_v31 = vpop.f32.mrb[9].mxu1  ;;  %v4120_v32 = vpack.c.bf16 %v1555_v19, %v1554_v60 }
 0xbd0   :  { %v1198_v38 = vmax.f32 %v1189_v31, 1e-30 }
 0xbd1   :  { %4420 = vrcp.f32 %v1199_v36 }
 0xbd2   :  { %4422 = vrcp.f32 %v1198_v38 }
 0xbdb   :  { %v4421_v34 = vpop.eup %4420 }
 0xbdc   :  { %v4423_v41 = vpop.eup %4422  ;;  %v1203_v49 = vmul.f32 %v4421_v34, %v4419_v51 }
 0xbdd   :  { %v1201_v46 = vmul.f32 %v4423_v41, %v4417_v58 }
 0xbdf   :  { %3709 = vmatprep.mubr.msk.f32.mxu1 %vm294_vm5, %v1201_v46 }
 0xbe0   :  { %3710 = vmatmul.mubr.msk.f32.vlgmr.msra.gmra.mrb[10].mxu1 %vm294_vm5, %v1203_v49 }
 0xbe1   :  { %4107 = vmatpush3.bf16.msra.mxu1 %v4104_v15  ;;  %v1557_v15 = vld [vmem:[#allocation5 + $0x158] sm:$0xff] }
 0xbe2   :  { %4109 = vmatprep.subr.bf16.mxu1 %v4108_v20  ;;  %v4124_v17 = vpack.c.bf16 %v1557_v15, %v1556_v6 }
 0xbe5   :  { %4111 = vmatpush3.bf16.msra.mxu1 %v4108_v20 }
 0xcb3   :  { %v3711_v39 = vpop.f32.mrb[10].mxu1 }
 0xcb4   :  { %v1308_v50 = vpop.f32.mrb[11].mxu1 }
 0xcb5   :  { %3720 = vmatprep.mubr.msk.f32.mxu0 %vm76_vm0, %v1308_v50 }
 0xcb6   :  { %3721 = vmatmul.mubr.msk.f32.vlgmr.msra.gmra.mrb[8].mxu0 %vm76_vm0, %v3711_v39 }
 0xcb7   :  { %4115 = vmatpush3.bf16.msra.mxu0 %v4112_v28 }
 0xcb8   :  { %4117 = vmatprep.subr.bf16.mxu0 %v4116_v30 }
 0xcbb   :  { %4119 = vmatpush3.bf16.msra.mxu0 %v4116_v30  ;;  %v3284_v30 = vld [vmem:[#allocation5 + $0x160] ss:$0 sm:$0xff] }
 0xcbc   :  { %4121 = vmatprep.subr.bf16.mxu0 %v4120_v32 }
 0xcbf   :  { %4123 = vmatpush3.bf16.msra.mxu0 %v4120_v32 }
 0xcc0   :  { %4125 = vmatprep.subr.bf16.mxu0 %v4124_v17 }
 0xcc3   :  { %4127 = vmatpush3.bf16.msra.mxu0 %v4124_v17 }
 0xcc4   :  { %4161 = vmatprep.subr.bf16.mxu0 %v4713_v33 }
 0xd89   :  { %v3722_v10 = vpop.f32.mrb[8].mxu0 }
 0xd8a   :  { %v1399_v57 = vadd.f32 %v3722_v10, %v3274_v45  ;;  %v1393_v59 = vpop.f32.mrb[9].mxu0 }
 0xd8b   :  { %v1394_v53 = vadd.f32 %v3274_v45, %v1393_v59 }
 0xd8c   :  { %v4932_v56 = vadd.f32 %v1399_v57, %v4802_v44 }
 0xd8d   :  { %v4935_v58 = vadd.f32 %v1394_v53, %v4805_v21 }
 0xd8e   :  { %v1409_v51 = vsel %vm76_vm0, %v4932_v56, 0.0 }
 0xd8f   :  { %1410 = vadd.xlane.f32.xlu1 %v1409_v51  ;;  %v1406_v61 = vsel %vm76_vm0, %v4935_v58, 0.0 }
 0xd90   :  { %1407 = vadd.xlane.f32.xlu0 %v1406_v61 }
 0xe1c   :  { %v1411_v8 = vpop.xlane.xlu1 %1410 }
 0xe1d   :  { %v1413_v9 = vmul.f32 0.03125, %v1411_v8  ;;  %v1408_v0 = vpop.xlane.xlu0 %1407  ;;  %v3277_v8 = vld [vmem:[#allocation5 + $0xe8] ss:$0 sm:$0xff] }
 0xe1e   :  { %v1412_v62 = vmul.f32 0.03125, %v1408_v0 }
 0xe1f   :  { %v1415_v13 = vsub.f32 %v4932_v56, %v1413_v9 }
 0xe20   :  { %v1414_v44 = vsub.f32 %v4935_v58, %v1412_v62  ;;  %v3278_v62 = vld [vmem:[#allocation5 + $0xf0] ss:$0 sm:$0xff] }
 0xe21   :  { %v1417_v14 = vmul.f32 %v1415_v13, %v1415_v13 }
 0xe22   :  { %v1416_v48 = vmul.f32 %v1414_v44, %v1414_v44  ;;  %v1444_v9 = vmul.f32 %v3277_v8, %v1414_v44  ;;  %v3279_v44 = vld [vmem:[#allocation5 + $0x118] ss:$0 sm:$0xff] }
 0xe23   :  { %v1421_v2 = vsel %vm76_vm0, %v1417_v14, 0.0 }
 0xe24   :  { %v1418_v21 = vsel %vm76_vm0, %v1416_v48, 0.0 }
 0xe25   :  { %1419 = vadd.xlane.f32.xlu0 %v1418_v21  ;;  %v1445_v21 = vmul.f32 %v3277_v8, %v1415_v13  ;;  %v1705_v8 = vld [vmem:[#allocation5 + $0x180] sm:$0xff] }
 0xe29   :  { %1422 = vadd.xlane.f32.xlu0 %v1421_v2 }
 0xeb2   :  { %v1420_v36 = vpop.xlane.xlu0 %1419 }
 0xeb3   :  { %v1424_v31 = vmul.f32 0.032258064, %v1420_v36 }
 0xeb5   :  { %4424 = vrsqrt.f32 %v1424_v31  ;;  %vm1428_vm11 = vcmp.eq.f32.partialorder %v1424_v31, inf  ;;  %v1431_v49 = vand.u32 2147483648, %v1424_v31  ;;  %vm1430_vm12 = vcmp.eq.f32.partialorder %v1424_v31, 0.0 }
 0xeb6   :  { %v1423_v38 = vpop.xlane.xlu0 %1422 }
 0xeb7   :  { %v1425_v34 = vmul.f32 0.032258064, %v1423_v38 }
 0xeb9   :  { %4426 = vrsqrt.f32 %v1425_v34  ;;  %vm1435_vm13 = vcmp.eq.f32.partialorder %v1425_v34, inf  ;;  %v1438_v59 = vand.u32 2147483648, %v1425_v34  ;;  %vm1437_vm14 = vcmp.eq.f32.partialorder %v1425_v34, 0.0 }
 0xebf   :  { %v4425_v41 = vpop.eup %4424 }
 0xec0   :  { %v1427_v46 = vmul.f32 %v4425_v41, %v1424_v31 }
 0xec2   :  { %v1429_v39 = vsel %vm1428_vm11, %v1424_v31, %v1427_v46 }
 0xec3   :  { %v4427_v50 = vpop.eup %4426  ;;  %v1432_v45 = vsel %vm1430_vm12, %v1431_v49, %v1429_v39 }
 0xec4   :  { %v1434_v10 = vmul.f32 %v4427_v50, %v1425_v34  ;;  %v1446_v57 = vadd.f32 1e-06, %v1432_v45 }
 0xec6   :  { %v1436_v53 = vsel %vm1435_vm13, %v1425_v34, %v1434_v10  ;;  %4428 = vrcp.f32 %v1446_v57 }
 0xec7   :  { %v1439_v51 = vsel %vm1437_vm14, %v1438_v59, %v1436_v53  ;;  %v1702_v59 = vld [vmem:[#allocation5 + $0x168] sm:$0xff]  ;;  %v1703_v53 = vld [vmem:[#allocation5 + $0x170] sm:$0xff] }
 0xec8   :  { %v1447_v61 = vadd.f32 1e-06, %v1439_v51  ;;  %v1704_v51 = vld [vmem:[#allocation5 + $0x178] sm:$0xff] }
 0xeca   :  { %4430 = vrcp.f32 %v1447_v61  ;;  %v4128_v61 = vpack.c.bf16 %v1703_v53, %v1702_v59 }
 0xecc   :  { %4129 = vmatprep.subr.bf16.mxu1 %v4128_v61 }
 0xed0   :  { %v4429_v0 = vpop.eup %4428 }
 0xed1   :  { %v1449_v48 = vmul.f32 %v4429_v0, %v1444_v9  ;;  %v4132_v9 = vpack.c.bf16 %v1705_v8, %v1704_v51  ;;  %v4992_v51 = vld [vmem:[#allocation5 + $0x308] sm:$0xff]  ;;  %v4995_v8 = vld [vmem:[#allocation5 + $0x2f0] sm:$0xff] }
 0xed3   :  { %v1456_v14 = vadd.f32 %v3278_v62, %v1449_v48 }
 0xed4   :  { %v4431_v2 = vpop.eup %4430 }
 0xed5   :  { %v1451_v5 = vmul.f32 %v4431_v2, %v1445_v21  ;;  %3731 = vmatprep.mubr.msk.f32.mxu1 %vm76_vm0, %v1456_v14 }
 0xed7   :  { %v1457_v40 = vadd.f32 %v3278_v62, %v1451_v5 }
 0xed9   :  { %3732 = vmatmul.mubr.msk.f32.vlgmr.msra.gmra.mrb[12].mxu1 %vm76_vm0, %v1457_v40 }
 0xeda   :  { %4131 = vmatpush3.bf16.msra.mxu1 %v4128_v61 }
 0xedb   :  { %4133 = vmatprep.subr.bf16.mxu1 %v4132_v9 }
 0xede   :  { %4135 = vmatpush3.bf16.msra.mxu1 %v4132_v9 }
 0xfac   :  { %v3733_v20 = vpop.f32.mrb[12].mxu1 }
 0xfad   :  { %v1545_v22 = vadd.f32 %v3733_v20, %v3279_v44  ;;  %v1539_v25 = vpop.f32.mrb[13].mxu1 }
 0xfae   :  { %v1540_v13 = vadd.f32 %v3279_v44, %v1539_v25 }
 0xfaf   :  { %v1549_v28 = vmax.f32 %v1545_v22, 0.0 }
 0xfb0   :  { %v1548_v27 = vmax.f32 %v1540_v13, 0.0 }
 0xfb2   :  { %3750 = vmatprep.mubr.msk.f32.mxu0 %vm294_vm5, %v1548_v27  ;;  %v3285_v27 = vld [vmem:[#allocation5 + $0x230] ss:$0 sm:$0xff] }
 0xfb3   :  { %3751 = vmatmul.mubr.msk.f32.vlgmr.msra.gmra.mrb[10].mxu0 %vm294_vm5, %v1549_v28 }
 0xfb4   :  { %4163 = vmatpush3.bf16.msra.mxu0 %v4713_v33 }
 0xfb5   :  { %4165 = vmatprep.subr.bf16.mxu0 %v4721_v37 }
 0xfb8   :  { %4167 = vmatpush3.bf16.msra.mxu0 %v4721_v37 }
 0xfb9   :  { %4169 = vmatprep.subr.bf16.mxu0 %v4731_v42 }
 0xfbc   :  { %4171 = vmatpush3.bf16.msra.mxu0 %v4731_v42 }
 0xfbd   :  { %4173 = vmatprep.subr.bf16.mxu0 %v4743_v47 }
 0xfc0   :  { %4175 = vmatpush3.bf16.msra.mxu0 %v4743_v47 }
0x1086   :  { %v3752_v29 = vpop.f32.mrb[10].mxu0 }
0x1087   :  { %v1640_v60 = vadd.f32 %v3752_v29, %v4932_v56  ;;  %v1630_v19 = vpop.f32.mrb[11].mxu0 }
0x1088   :  { %v1639_v32 = vadd.f32 %v1630_v19, %v4935_v58  ;;  %v3286_v19 = vld [vmem:[#allocation5 + $0x238] ss:$0 sm:$0xff] }
0x1089   :  { %v4959_v36 = vadd.f32 %v3284_v30, %v1640_v60 }
0x108a   :  { %v4961_v31 = vadd.f32 %v3284_v30, %v1639_v32 }
0x108b   :  { %v1653_v38 = vsel %vm76_vm0, %v4959_v36, 0.0 }
0x108c   :  { %1654 = vadd.xlane.f32.xlu1 %v1653_v38  ;;  %v1650_v34 = vsel %vm76_vm0, %v4961_v31, 0.0 }
0x108d   :  { %1651 = vadd.xlane.f32.xlu0 %v1650_v34 }
0x1119   :  { %v1655_v41 = vpop.xlane.xlu1 %1654 }
0x111a   :  { %v1657_v46 = vmul.f32 0.03125, %v1655_v41  ;;  %v1652_v49 = vpop.xlane.xlu0 %1651 }
0x111b   :  { %v1656_v39 = vmul.f32 0.03125, %v1652_v49 }
0x111c   :  { %v1659_v56 = vsub.f32 %v4959_v36, %v1657_v46  ;;  %v3287_v46 = vld [vmem:[#allocation5 + $0x188] ss:$0 sm:$0xff] }
0x111d   :  { %v1658_v58 = vsub.f32 %v4961_v31, %v1656_v39 }
0x111e   :  { %v1661_v50 = vmul.f32 %v1659_v56, %v1659_v56  ;;  %v1689_v28 = vmul.f32 %v3285_v27, %v1659_v56 }
0x111f   :  { %v1660_v45 = vmul.f32 %v1658_v58, %v1658_v58  ;;  %v1688_v30 = vmul.f32 %v3285_v27, %v1658_v58 }
0x1120   :  { %v1665_v10 = vsel %vm76_vm0, %v1661_v50, 0.0 }
0x1121   :  { %1666 = vadd.xlane.f32.xlu1 %v1665_v10  ;;  %v1662_v57 = vsel %vm76_vm0, %v1660_v45, 0.0 }
0x1122   :  { %1663 = vadd.xlane.f32.xlu0 %v1662_v57  ;;  %v4987_v57 = vld [vmem:[#allocation5 + $0x2f8] sm:$0xff] }
0x11ae   :  { %v1667_v0 = vpop.xlane.xlu1 %1666 }
0x11af   :  { %v1669_v62 = vmul.f32 0.032258064, %v1667_v0  ;;  %v1664_v48 = vpop.xlane.xlu0 %1663  ;;  %v4998_v0 = vld [vmem:[#allocation5 + $0x300] sm:$0xff] }
0x11b0   :  { %v1668_v21 = vmul.f32 0.032258064, %v1664_v48 }
0x11b1   :  { %4432 = vrsqrt.f32 %v1669_v62  ;;  %vm1679_vm15 = vcmp.eq.f32.partialorder %v1669_v62, inf  ;;  %v1682_v40 = vand.u32 2147483648, %v1669_v62  ;;  %vm1681_vm1 = vcmp.eq.f32.partialorder %v1669_v62, 0.0 }
0x11b2   :  { %4434 = vrsqrt.f32 %v1668_v21  ;;  %vm1672_vm2 = vcmp.eq.f32.partialorder %v1668_v21, inf  ;;  %v1675_v17 = vand.u32 2147483648, %v1668_v21  ;;  %vm1674_vm3 = vcmp.eq.f32.partialorder %v1668_v21, 0.0 }
0x11bb   :  { %v4433_v14 = vpop.eup %4432 }
0x11bc   :  { %v4435_v2 = vpop.eup %4434  ;;  %v1678_v5 = vmul.f32 %v4433_v14, %v1669_v62  ;;  %v5003_v14 = vld [vmem:[#allocation5 + $0x2e0] sm:$0xff] }
0x11bd   :  { %v1671_v6 = vmul.f32 %v4435_v2, %v1668_v21 }
0x11be   :  { %v1680_v15 = vsel %vm1679_vm15, %v1669_v62, %v1678_v5 }
0x11bf   :  { %v1683_v44 = vsel %vm1681_vm1, %v1682_v40, %v1680_v15  ;;  %v1673_v20 = vsel %vm1672_vm2, %v1668_v21, %v1671_v6  ;;  %v5013_v6 = vld [vmem:[#allocation5 + $0x318] sm:$0xff] }
0x11c0   :  { %v1691_v22 = vadd.f32 1e-06, %v1683_v44  ;;  %v1676_v25 = vsel %vm1674_vm3, %v1675_v17, %v1673_v20  ;;  %v5016_v17 = vld [vmem:[#allocation5 + $0x310] sm:$0xff] }
0x11c1   :  { %v1690_v13 = vadd.f32 1e-06, %v1676_v25 }
0x11c2   :  { %4436 = vrcp.f32 %v1691_v22  ;;  %v5023_v22 = vld [vmem:[#allocation5 + $0x328] sm:$0xff] }
0x11c3   :  { %4438 = vrcp.f32 %v1690_v13  ;;  %v5026_v13 = vld [vmem:[#allocation5 + $0x320] sm:$0xff] }
0x11cc   :  { %v4437_v29 = vpop.eup %4436 }
0x11cd   :  { %v4439_v60 = vpop.eup %4438  ;;  %v1695_v32 = vmul.f32 %v4437_v29, %v1689_v28 }
0x11ce   :  { %v1693_v38 = vmul.f32 %v4439_v60, %v1688_v30  ;;  %v5037_v60 = vld [vmem:[#allocation5 + $0x2e8] sm:$0xff] }
0x11cf   :  { %v1701_v41 = vadd.f32 %v3286_v19, %v1695_v32 }
0x11d0   :  { %v1700_v34 = vadd.f32 %v3286_v19, %v1693_v38  ;;  %v4490_v38 = vld [vmem:[#allocation2 + $0x28] sm:$0xff] }
0x11d2   :  { %3761 = vmatprep.mubr.msk.f32.mxu1 %vm76_vm0, %v1700_v34 }
0x11d3   :  { %3762 = vmatmul.mubr.msk.f32.vlgmr.msra.gmra.mrb[14].mxu1 %vm76_vm0, %v1701_v41 }
0x12a6   :  { %v3763_v49 = vpop.f32.mrb[14].mxu1 }
0x12a7   :  { %v4973_v39 = vadd.f32 %v3763_v49, %v3287_v46  ;;  %v1783_v50 = vpop.f32.mrb[15].mxu1 }
0x12a8   :  { %v4975_v45 = vadd.f32 %v3287_v46, %v1783_v50  ;;  %v4491_v46 = vld [vmem:[#allocation2 + $0x20] sm:$0xff] }
0x12a9   :  { %1811 = vrot.lane.b32.xlu1 %v4973_v39, %s4572_s1 }
0x12aa   :  { %1809 = vrot.lane.b32.xlu0 %v4975_v45, %s4572_s1 }
0x12ad   :  { %1799 = vrot.lane.b32.xlu1 %v4975_v45, %s4573_s6 }
0x12b1   :  { %1801 = vrot.lane.b32.xlu1 %v4973_v39, %s4573_s6 }
0x131b   :  { %v1812_v56 = vpop.permute.xlu1 %1811 }
0x131c   :  { %v1816_v58 = vsel %vm76_vm0, %v1812_v56, %v4973_v39  ;;  %v1810_v10 = vpop.permute.xlu0 %1809 }
0x131d   :  { %v1818_v59 = vmul.f32 %v4987_v57, %v1816_v58  ;;  %v1815_v53 = vsel %vm76_vm0, %v1810_v10, %v4975_v45  ;;  %v1820_v61 = vmul.f32 %v4992_v51, %v1816_v58  ;;  %v1822_v15 = vmul.f32 %v5013_v6, %v1816_v58 }
0x131e   :  { %v1817_v9 = vmul.f32 %v4995_v8, %v1815_v53  ;;  %v1819_v62 = vmul.f32 %v4998_v0, %v1815_v53  ;;  %v1821_v44 = vmul.f32 %v5016_v17, %v1815_v53  ;;  %v1824_v25 = vmul.f32 %v5023_v22, %v1816_v58 }
0x131f   :  { %v1800_v48 = vpop.permute.xlu1 %1799  ;;  %v1823_v27 = vmul.f32 %v5026_v13, %v1815_v53  ;;  %v1827_v58 = vmul.f32 %v4975_v45, %v4771_v11  ;;  %v1828_v10 = vmul.f32 %v4973_v39, %v4767_v7  ;;  %v1831_v53 = vmul.f32 %v4975_v45, %v4790_v26 }
0x1320   :  { %v1805_v21 = vsel %vm76_vm0, %v4975_v45, %v1800_v48  ;;  %v4136_v5 = vpack.c.bf16 %v1818_v59, %v1817_v9  ;;  %v4142_v40 = vpack.c.bf16 %v1820_v61, %v1819_v62  ;;  %v4148_v20 = vpack.c.bf16 %v1822_v15, %v1821_v44 }
0x1321   :  { %v1807_v2 = vmul.f32 %v5003_v14, %v1805_v21  ;;  %v4154_v28 = vpack.c.bf16 %v1824_v25, %v1823_v27  ;;  %v4357_v59 = vpack.i.bf16 %v1828_v10, %v1827_v58  ;;  %v1832_v61 = vmul.f32 %v4973_v39, %v4785_v23  ;;  %v1795_v10 = vld [vmem:[#allocation5 + $0x1a8] sm:$0xff] }
0x1322   :  { %4138 = vmatprep.subr.msk.bf16.mxu1 %vm4669_vm6, %v4136_v5  ;;  %v1825_v9 = vmul.f32 %v4975_v45, %v4763_v3  ;;  %v1826_v62 = vmul.f32 %v4973_v39, %v4759_v63  ;;  %v1829_v7 = vmul.f32 %v4975_v45, %v4780_v18  ;;  %v1830_v26 = vmul.f32 %v4973_v39, %v4776_v16 }
0x1323   :  { %3780 = vmatprep.mubr.msk.f32.mxu1 %vm294_vm5, %v1807_v2  ;;  %4141 = vmatpush3.bf16.xpose.msk.msra.mxu1 %vm4669_vm6, %v4136_v5  ;;  %v1802_v29 = vpop.permute.xlu1 %1801  ;;  %v4367_v48 = vpack.i.bf16 %v1832_v61, %v1831_v53 }
0x1324   :  { %4144 = vmatprep.subr.msk.bf16.mxu1 %vm4669_vm6, %v4142_v40  ;;  %v1806_v30 = vsel %vm76_vm0, %v4973_v39, %v1802_v29  ;;  %v4352_v11 = vpack.i.bf16 %v1826_v62, %v1825_v9  ;;  %v4362_v23 = vpack.i.bf16 %v1830_v26, %v1829_v7 }
0x1325   :  { %v1808_v19 = vmul.f32 %v5037_v60, %v1806_v30 }
0x132b   :  { %4147 = vmatpush3.bf16.xpose.msk.msra.mxu1 %vm4669_vm6, %v4142_v40 }
0x132c   :  { %4150 = vmatprep.subr.msk.bf16.mxu1 %vm4669_vm6, %v4148_v20 }
0x1333   :  { %4153 = vmatpush3.bf16.xpose.msk.msra.mxu1 %vm4669_vm6, %v4148_v20 }
0x1334   :  { %4156 = vmatprep.subr.msk.bf16.mxu1 %vm4669_vm6, %v4154_v28 }
0x133b   :  { %4159 = vmatpush3.bf16.xpose.msk.msra.mxu1 %vm4669_vm6, %v4154_v28 }
0x1342   :  { %3781 = vmatmul.mubr.msk.f32.vlgmr.msra.gmra.mrb[16].mxu1 %vm294_vm5, %v1808_v19 }
0x1415   :  { %v3782_v32 = vpop.f32.mrb[16].mxu1 }
0x1416   :  { %v1935_v34 = vadd.f32 %v4490_v38, %v3782_v32  ;;  %v1929_v41 = vpop.f32.mrb[17].mxu1 }
0x1417   :  { %v1930_v49 = vadd.f32 %v4491_v46, %v1929_v41 }
0x1418   :  { %v1941_v50 = vsel %vm294_vm5, %v1935_v34, -inf }
0x1419   :  { %1942 = vmax.xlane.f32.xlu1 %v1941_v50  ;;  %v1938_v56 = vsel %vm294_vm5, %v1930_v49, -inf  ;;  %v1793_v50 = vld [vmem:[#allocation5 + $0x198] sm:$0xff] }
0x141a   :  { %1939 = vmax.xlane.f32.xlu0 %v1938_v56  ;;  %v1794_v56 = vld [vmem:[#allocation5 + $0x1a0] sm:$0xff] }
0x142a   :  { %4358 = vrot.lane.b32.xlu1 %v4357_v59, %s4574_s7  ;;  %v4196_v59 = vpack.c.bf16 %v1795_v10, %v1794_v56  ;;  %v2292_v10 = vld [vmem:[#allocation5 + $0x1c0] sm:$0xff] }
0x142e   :  { %4368 = vrot.lane.b32.xlu1 %v4367_v48, %s4574_s7 }
0x1430   :  { %4353 = vrot.lane.b32.xlu0 %v4352_v11, %s4574_s7 }
0x1434   :  { %4363 = vrot.lane.b32.xlu0 %v4362_v23, %s4574_s7  ;;  %v2381_v23 = vld [vmem:[#allocation5 + $0x1e0] sm:$0xff] }
0x14a6   :  { %v1943_v21 = vpop.xlane.xlu1 %1942 }
0x14a7   :  { %v1945_v3 = vsub.f32 %v1935_v34, %v1943_v21  ;;  %v1940_v2 = vpop.xlane.xlu0 %1939  ;;  %v2382_v21 = vld [vmem:[#allocation5 + $0x1e8] sm:$0xff] }
0x14a8   :  { %v1944_v5 = vsub.f32 %v1930_v49, %v1940_v2  ;;  %v1792_v49 = vld [vmem:[#allocation5 + $0x190] sm:$0xff] }
0x14a9   :  { %v1948_v63 = vmul.f32 1.442695, %v1945_v3  ;;  %v4192_v58 = vpack.c.bf16 %v1793_v50, %v1792_v49  ;;  %v4208_v3 = vpack.c.bf16 %v2382_v21, %v2381_v23  ;;  %v2383_v2 = vld [vmem:[#allocation5 + $0x1f0] sm:$0xff] }
0x14aa   :  { %v1946_v40 = vmul.f32 1.442695, %v1944_v5  ;;  %v4359_v45 = vpop.permute.xlu1 %4358  ;;  %v2384_v5 = vld [vmem:[#allocation5 + $0x1f8] sm:$0xff] }
0x14ab   :  { %v4354_v15 = vpop.permute.xlu0 %4353  ;;  %v4361_v16 = vunpack.i.h.bf16 %v4359_v45  ;;  %v4360_v39 = vunpack.i.l.bf16 %v4359_v45  ;;  %4193 = vmatprep.subr.bf16.mxu1 %v4192_v58 }
0x14ac   :  { %4440 = vpow2.f32 %v1946_v40  ;;  %v4356_v44 = vunpack.i.h.bf16 %v4354_v15  ;;  %v4355_v20 = vunpack.i.l.bf16 %v4354_v15  ;;  %4195 = vmatpush3.bf16.msra.mxu1 %v4192_v58  ;;  %v4212_v15 = vpack.c.bf16 %v2384_v5, %v2383_v2  ;;  %v2291_v58 = vld [vmem:[#allocation5 + $0x1b8] sm:$0xff] }
0x14ad   :  { %4442 = vpow2.f32 %v1948_v63  ;;  %v4180_v29 = vpack.c.bf16 %v4361_v16, %v4360_v39  ;;  %4197 = vmatprep.subr.bf16.mxu1 %v4196_v59 }
0x14ae   :  { %v4176_v18 = vpack.c.bf16 %v4356_v44, %v4355_v20  ;;  %v4369_v32 = vpop.permute.xlu1 %4368  ;;  %v4492_v44 = vld [vmem:[#allocation2 + $0x10] sm:$0xff]  ;;  %v4493_v20 = vld [vmem:[#allocation2 + $0x18] sm:$0xff] }
0x14af   :  { %v4364_v25 = vpop.permute.xlu0 %4363  ;;  %v4371_v38 = vunpack.i.h.bf16 %v4369_v32  ;;  %v4370_v34 = vunpack.i.l.bf16 %v4369_v32 }
0x14b0   :  { %4177 = vmatprep.subr.bf16.mxu0 %v4176_v18  ;;  %v4366_v30 = vunpack.i.h.bf16 %v4364_v25  ;;  %v4365_v19 = vunpack.i.l.bf16 %v4364_v25  ;;  %4199 = vmatpush3.bf16.msra.mxu1 %v4196_v59  ;;  %v2293_v59 = vld [vmem:[#allocation5 + $0x1c8] sm:$0xff] }
0x14b1   :  { %v4188_v46 = vpack.c.bf16 %v4371_v38, %v4370_v34  ;;  %4209 = vmatprep.subr.bf16.mxu1 %v4208_v3 }
0x14b2   :  { %v4184_v41 = vpack.c.bf16 %v4366_v30, %v4365_v19 }
0x14b6   :  { %v4441_v27 = vpop.eup %4440 }
0x14b7   :  { %v4443_v28 = vpop.eup %4442  ;;  %3799 = vmatprep.mubr.msk.f32.mxu0 %vm294_vm5, %v4441_v27 }
0x14b8   :  { %3800 = vmatmul.mubr.msk.f32.vlgmr.msra.gmra.mrb[12].mxu0 %vm294_vm5, %v4443_v28 }
0x14b9   :  { %4179 = vmatpush3.bf16.msra.mxu0 %v4176_v18  ;;  %v3304_v18 = vld [vmem:[#allocation5 + $0x1b0] ss:$0 sm:$0xff] }
0x14ba   :  { %4181 = vmatprep.subr.bf16.mxu0 %v4180_v29 }
0x14bd   :  { %4183 = vmatpush3.bf16.msra.mxu0 %v4180_v29 }
0x14be   :  { %4185 = vmatprep.subr.bf16.mxu0 %v4184_v41 }
0x14c1   :  { %4187 = vmatpush3.bf16.msra.mxu0 %v4184_v41 }
0x14c2   :  { %4189 = vmatprep.subr.bf16.mxu0 %v4188_v46 }
0x14c5   :  { %4191 = vmatpush3.bf16.msra.mxu0 %v4188_v46 }
0x158b   :  { %v3801_v53 = vpop.f32.mrb[12].mxu0 }
0x158c   :  { %v2032_v61 = vmax.f32 %v3801_v53, 1e-30  ;;  %v2022_v9 = vpop.f32.mrb[13].mxu0  ;;  %v4200_v53 = vpack.c.bf16 %v2292_v10, %v2291_v58 }
0x158d   :  { %v2031_v62 = vmax.f32 %v2022_v9, 1e-30 }
0x158e   :  { %4444 = vrcp.f32 %v2032_v61  ;;  %v2294_v61 = vld [vmem:[#allocation5 + $0x1d0] sm:$0xff]  ;;  %4201 = vmatprep.subr.bf16.mxu0 %v4200_v53 }
0x158f   :  { %4446 = vrcp.f32 %v2031_v62  ;;  %v4204_v9 = vpack.c.bf16 %v2294_v61, %v2293_v59 }
0x1598   :  { %v4445_v48 = vpop.eup %4444 }
0x1599   :  { %v4447_v11 = vpop.eup %4446  ;;  %v2036_v26 = vmul.f32 %v4445_v48, %v4443_v28  ;;  %v3312_v28 = vld [vmem:[#allocation5 + $0x200] ss:$0 sm:$0xff] }
0x159a   :  { %v2034_v7 = vmul.f32 %v4447_v11, %v4441_v27 }
0x159c   :  { %3818 = vmatprep.mubr.msk.f32.mxu0 %vm294_vm5, %v2034_v7 }
0x159d   :  { %3819 = vmatmul.mubr.msk.f32.vlgmr.msra.gmra.mrb[14].mxu0 %vm294_vm5, %v2036_v26 }
0x159e   :  { %4203 = vmatpush3.bf16.msra.mxu0 %v4200_v53 }
0x159f   :  { %4205 = vmatprep.subr.bf16.mxu0 %v4204_v9 }
0x15a2   :  { %4207 = vmatpush3.bf16.msra.mxu0 %v4204_v9 }
0x1670   :  { %v3820_v63 = vpop.f32.mrb[14].mxu0 }
0x1671   :  { %v2141_v40 = vpop.f32.mrb[15].mxu0 }
0x1672   :  { %3829 = vmatprep.mubr.msk.f32.mxu1 %vm76_vm0, %v2141_v40 }
0x1673   :  { %3830 = vmatmul.mubr.msk.f32.vlgmr.msra.gmra.mrb[18].mxu1 %vm76_vm0, %v3820_v63 }
0x1674   :  { %4211 = vmatpush3.bf16.msra.mxu1 %v4208_v3  ;;  %3851 = vmatprep.mubr.msk.f32.mxu1 %vm76_vm0, %v4492_v44 }
0x1675   :  { %4213 = vmatprep.subr.bf16.mxu1 %v4212_v15 }
0x1678   :  { %4215 = vmatpush3.bf16.msra.mxu1 %v4212_v15 }
0x1679   :  { %4241 = vmatprep.subr.bf16.mxu1 %v4713_v33 }
0x167b   :  { %3852 = vmatmul.mubr.msk.f32.vlgmr.msra.gmra.mrb[20].mxu1 %vm76_vm0, %v4493_v20 }
0x167c   :  { %4243 = vmatpush3.bf16.msra.mxu1 %v4713_v33 }
0x167d   :  { %4245 = vmatprep.subr.bf16.mxu1 %v4721_v37 }
0x1680   :  { %4247 = vmatpush3.bf16.msra.mxu1 %v4721_v37 }
0x1681   :  { %4249 = vmatprep.subr.bf16.mxu1 %v4731_v42 }
0x1684   :  { %4251 = vmatpush3.bf16.msra.mxu1 %v4731_v42 }
0x1685   :  { %4253 = vmatprep.subr.bf16.mxu1 %v4743_v47 }
0x1688   :  { %4255 = vmatpush3.bf16.msra.mxu1 %v4743_v47 }
0x1746   :  { %v3831_v45 = vpop.f32.mrb[18].mxu1 }
0x1747   :  { %v2232_v16 = vadd.f32 %v3831_v45, %v3304_v18  ;;  %v2226_v39 = vpop.f32.mrb[19].mxu1 }
0x1748   :  { %v2227_v25 = vadd.f32 %v3304_v18, %v2226_v39 }
0x1749   :  { %v5080_v27 = vadd.f32 %v2232_v16, %v4959_v36 }
0x174a   :  { %v5083_v33 = vadd.f32 %v2227_v25, %v4961_v31 }
0x174b   :  { %v2242_v37 = vsel %vm76_vm0, %v5080_v27, 0.0 }
0x174c   :  { %2243 = vadd.xlane.f32.xlu1 %v2242_v37  ;;  %v2239_v42 = vsel %vm76_vm0, %v5083_v33, 0.0 }
0x174d   :  { %2240 = vadd.xlane.f32.xlu0 %v2239_v42  ;;  %v3307_v42 = vld [vmem:[#allocation5 + $0x240] ss:$0 sm:$0xff] }
0x174e   :  { %v3853_v47 = vpop.f32.mrb[20].mxu1 }
0x174f   :  { %v2456_v29 = vpop.f32.mrb[21].mxu1  ;;  %v5091_v19 = vadd.f32 %v3853_v47, %v3312_v28 }
0x1750   :  { %v5089_v30 = vadd.f32 %v3312_v28, %v2456_v29  ;;  %v3308_v29 = vld [vmem:[#allocation5 + $0x248] ss:$0 sm:$0xff] }
0x175d   :  { %2486 = vrot.lane.b32.xlu1 %v5091_v19, %s4573_s6 }
0x17d9   :  { %v2244_v36 = vpop.xlane.xlu1 %2243 }
0x17da   :  { %v2246_v31 = vmul.f32 0.03125, %v2244_v36  ;;  %v2241_v32 = vpop.xlane.xlu0 %2240 }
0x17db   :  { %v2245_v38 = vmul.f32 0.03125, %v2241_v32 }
0x17dc   :  { %v2248_v34 = vsub.f32 %v5080_v27, %v2246_v31 }
0x17dd   :  { %v2247_v41 = vsub.f32 %v5083_v33, %v2245_v38  ;;  %v2487_v11 = vpop.permute.xlu1 %2486 }
0x17de   :  { %v2250_v50 = vmul.f32 %v2248_v34, %v2248_v34  ;;  %v2491_v23 = vsel %vm76_vm0, %v5091_v19, %v2487_v11  ;;  %v2278_v31 = vmul.f32 %v3307_v42, %v2248_v34 }
0x17df   :  { %v2249_v46 = vmul.f32 %v2247_v41, %v2247_v41  ;;  %v2493_v21 = vmul.f32 %v4987_v57, %v2491_v23  ;;  %v2277_v28 = vmul.f32 %v3307_v42, %v2247_v41  ;;  %v2495_v38 = vmul.f32 %v4992_v51, %v2491_v23 }
0x17e0   :  { %v2254_v56 = vsel %vm76_vm0, %v2250_v50, 0.0  ;;  %v2497_v41 = vmul.f32 %v5013_v6, %v2491_v23  ;;  %v3309_v6 = vld [vmem:[#allocation5 + $0x1d8] ss:$0 sm:$0xff] }
0x17e1   :  { %v2251_v49 = vsel %vm76_vm0, %v2249_v46, 0.0 }
0x17e2   :  { %2252 = vadd.xlane.f32.xlu0 %v2251_v49 }
0x17e6   :  { %2255 = vadd.xlane.f32.xlu0 %v2254_v56 }
0x17fc   :  { %2484 = vrot.lane.b32.xlu0 %v5089_v30, %s4573_s6 }
0x186f   :  { %v2253_v62 = vpop.xlane.xlu0 %2252 }
0x1870   :  { %v2257_v48 = vmul.f32 0.032258064, %v2253_v62 }
0x1872   :  { %4448 = vrsqrt.f32 %v2257_v48  ;;  %vm2261_vm4 = vcmp.eq.f32.partialorder %v2257_v48, inf  ;;  %v2264_v44 = vand.u32 2147483648, %v2257_v48  ;;  %vm2263_vm7 = vcmp.eq.f32.partialorder %v2257_v48, 0.0 }
0x1873   :  { %v2256_v7 = vpop.xlane.xlu0 %2255 }
0x1874   :  { %v2258_v26 = vmul.f32 0.032258064, %v2256_v7 }
0x1876   :  { %4450 = vrsqrt.f32 %v2258_v26  ;;  %vm2268_vm8 = vcmp.eq.f32.partialorder %v2258_v26, inf  ;;  %v2271_v39 = vand.u32 2147483648, %v2258_v26  ;;  %vm2270_vm9 = vcmp.eq.f32.partialorder %v2258_v26, 0.0 }
0x1877   :  { %v2485_v3 = vpop.permute.xlu0 %2484 }
0x1878   :  { %v2490_v2 = vsel %vm76_vm0, %v5089_v30, %v2485_v3  ;;  %v4495_v3 = vld [vmem:[#allocation2 + $0x30] sm:$0xff] }
0x1879   :  { %v2492_v5 = vmul.f32 %v4995_v8, %v2490_v2  ;;  %v2494_v46 = vmul.f32 %v4998_v0, %v2490_v2  ;;  %v2496_v34 = vmul.f32 %v5016_v17, %v2490_v2  ;;  %v2499_v0 = vmul.f32 %v5023_v22, %v2491_v23 }
0x187a   :  { %v2498_v10 = vmul.f32 %v5026_v13, %v2490_v2 }
0x187b   :  { %v4216_v63 = vpack.c.bf16 %v2493_v21, %v2492_v5  ;;  %v4222_v58 = vpack.c.bf16 %v2495_v38, %v2494_v46  ;;  %v4228_v51 = vpack.c.bf16 %v2497_v41, %v2496_v34  ;;  %v2466_v41 = vld [vmem:[#allocation5 + $0x210] sm:$0xff]  ;;  %v2467_v34 = vld [vmem:[#allocation5 + $0x218] sm:$0xff] }
0x187c   :  { %v4449_v40 = vpop.eup %4448  ;;  %v4234_v59 = vpack.c.bf16 %v2499_v0, %v2498_v10  ;;  %v2468_v0 = vld [vmem:[#allocation5 + $0x220] sm:$0xff] }
0x187d   :  { %v2260_v15 = vmul.f32 %v4449_v40, %v2257_v48  ;;  %4218 = vmatprep.subr.msk.bf16.mxu0 %vm4669_vm6, %v4216_v63  ;;  %v4276_v10 = vpack.c.bf16 %v2468_v0, %v2467_v34  ;;  %v3332_v34 = vld [vmem:[#allocation5 + $0x250] ss:$0 sm:$0xff] }
0x187f   :  { %v2262_v20 = vsel %vm2261_vm4, %v2257_v48, %v2260_v15  ;;  %v2506_v15 = vmul.f32 %v5089_v30, %v4920_v55  ;;  %v2505_v55 = vmul.f32 %v5091_v19, %v4906_v12 }
0x1880   :  { %v4451_v18 = vpop.eup %4450  ;;  %v2265_v45 = vsel %vm2263_vm7, %v2264_v44, %v2262_v20  ;;  %v2507_v44 = vmul.f32 %v5091_v19, %v4915_v1  ;;  %v2500_v20 = vmul.f32 %v5089_v30, %v4893_v43 }
0x1881   :  { %v2267_v16 = vmul.f32 %v4451_v18, %v2258_v26  ;;  %v2279_v57 = vadd.f32 1e-06, %v2265_v45  ;;  %v2501_v18 = vmul.f32 %v5091_v19, %v4889_v35 }
0x1882   :  { %v4387_v45 = vpack.i.bf16 %v2507_v44, %v2506_v15 }
0x1883   :  { %v2269_v25 = vsel %vm2268_vm8, %v2258_v26, %v2267_v16  ;;  %4452 = vrcp.f32 %v2279_v57  ;;  %v4494_v26 = vld [vmem:[#allocation2 + $0x38] sm:$0xff] }
0x1884   :  { %v2272_v8 = vsel %vm2270_vm9, %v2271_v39, %v2269_v25 }
0x1885   :  { %v2280_v37 = vadd.f32 1e-06, %v2272_v8 }
0x1887   :  { %4454 = vrcp.f32 %v2280_v37 }
0x188d   :  { %v4453_v47 = vpop.eup %4452 }
0x188e   :  { %v2282_v36 = vmul.f32 %v4453_v47, %v2277_v28 }
0x1890   :  { %v2289_v32 = vadd.f32 %v3308_v29, %v2282_v36 }
0x1891   :  { %v4455_v49 = vpop.eup %4454 }
0x1892   :  { %v2284_v50 = vmul.f32 %v4455_v49, %v2278_v31  ;;  %3840 = vmatprep.mubr.msk.f32.mxu0 %vm76_vm0, %v2289_v32 }
0x1894   :  { %v2290_v56 = vadd.f32 %v3308_v29, %v2284_v50 }
0x1896   :  { %3841 = vmatmul.mubr.msk.f32.vlgmr.msra.gmra.mrb[16].mxu0 %vm76_vm0, %v2290_v56 }
0x1897   :  { %4221 = vmatpush3.bf16.xpose.msk.msra.mxu0 %vm4669_vm6, %v4216_v63  ;;  %v2502_v63 = vmul.f32 %v5089_v30, %v4901_v24  ;;  %v4372_v24 = vpack.i.bf16 %v2501_v18, %v2500_v20 }
0x1898   :  { %4224 = vmatprep.subr.msk.bf16.mxu0 %vm4669_vm6, %v4222_v58 }
0x189f   :  { %4227 = vmatpush3.bf16.xpose.msk.msra.mxu0 %vm4669_vm6, %v4222_v58  ;;  %v2465_v58 = vld [vmem:[#allocation5 + $0x208] sm:$0xff] }
0x18a0   :  { %4230 = vmatprep.subr.msk.bf16.mxu0 %vm4669_vm6, %v4228_v51 }
0x18a7   :  { %4233 = vmatpush3.bf16.xpose.msk.msra.mxu0 %vm4669_vm6, %v4228_v51  ;;  %v4272_v51 = vpack.c.bf16 %v2466_v41, %v2465_v58 }
0x18a8   :  { %4236 = vmatprep.subr.msk.bf16.mxu0 %vm4669_vm6, %v4234_v59 }
0x18af   :  { %4239 = vmatpush3.bf16.xpose.msk.msra.mxu0 %vm4669_vm6, %v4234_v59 }
0x18b0   :  { %4273 = vmatprep.subr.bf16.mxu0 %v4272_v51 }
0x1969   :  { %v3842_v17 = vpop.f32.mrb[16].mxu0 }
0x196a   :  { %v2372_v53 = vpop.f32.mrb[17].mxu0  ;;  %v2378_v22 = vadd.f32 %v3842_v17, %v3309_v6 }
0x196b   :  { %v2373_v61 = vadd.f32 %v3309_v6, %v2372_v53 }
0x196d   :  { %2472 = vrot.lane.b32.xlu1 %v2373_v61, %s4573_s6 }
0x1971   :  { %2474 = vrot.lane.b32.xlu1 %v2378_v22, %s4573_s6 }
0x19df   :  { %v2473_v13 = vpop.permute.xlu1 %2472 }
0x19e0   :  { %v2478_v9 = vsel %vm76_vm0, %v2373_v61, %v2473_v13 }
0x19e1   :  { %v2480_v62 = vmul.f32 %v5003_v14, %v2478_v9 }
0x19e3   :  { %3870 = vmatprep.mubr.msk.f32.mxu0 %vm294_vm5, %v2480_v62  ;;  %v2475_v48 = vpop.permute.xlu1 %2474 }
0x19e4   :  { %v2479_v4 = vsel %vm76_vm0, %v2378_v22, %v2475_v48 }
0x19e5   :  { %v2481_v11 = vmul.f32 %v5037_v60, %v2479_v4  ;;  %v2503_v60 = vmul.f32 %v5091_v19, %v4897_v52  ;;  %v2504_v52 = vmul.f32 %v5089_v30, %v4910_v54  ;;  %v3329_v4 = vld [vmem:[#allocation5 + $0x228] ss:$0 sm:$0xff] }
0x19e7   :  { %3871 = vmatmul.mubr.msk.f32.vlgmr.msra.gmra.mrb[18].mxu0 %vm294_vm5, %v2481_v11  ;;  %v4377_v40 = vpack.i.bf16 %v2503_v60, %v2502_v63  ;;  %v4382_v1 = vpack.i.bf16 %v2505_v55, %v2504_v52  ;;  %v2968_v52 = vld [vmem:[#allocation5 + $0x270] sm:$0xff] }
0x19e8   :  { %4275 = vmatpush3.bf16.msra.mxu0 %v4272_v51 }
0x19e9   :  { %4277 = vmatprep.subr.bf16.mxu0 %v4276_v10 }
0x19ec   :  { %4279 = vmatpush3.bf16.msra.mxu0 %v4276_v10  ;;  %v3333_v10 = vld [vmem:[#allocation5 + $0x258] ss:$0 sm:$0xff] }
0x1aba   :  { %v3872_v7 = vpop.f32.mrb[18].mxu0 }
0x1abb   :  { %v2610_v23 = vadd.f32 %v4494_v26, %v3872_v7  ;;  %v2604_v21 = vpop.f32.mrb[19].mxu0 }
0x1abc   :  { %v2605_v2 = vadd.f32 %v4495_v3, %v2604_v21 }
0x1abd   :  { %v2616_v5 = vsel %vm294_vm5, %v2610_v23, -inf }
0x1abe   :  { %2617 = vmax.xlane.f32.xlu1 %v2616_v5  ;;  %v2613_v14 = vsel %vm294_vm5, %v2605_v2, -inf }
0x1abf   :  { %2614 = vmax.xlane.f32.xlu0 %v2613_v14 }
0x1acf   :  { %4378 = vrot.lane.b32.xlu1 %v4377_v40, %s4572_s1 }
0x1ad3   :  { %4388 = vrot.lane.b32.xlu1 %v4387_v45, %s4572_s1  ;;  %v2966_v45 = vld [vmem:[#allocation5 + $0x260] sm:$0xff] }
0x1ad5   :  { %4373 = vrot.lane.b32.xlu0 %v4372_v24, %s4572_s1  ;;  %v2967_v24 = vld [vmem:[#allocation5 + $0x268] sm:$0xff] }
0x1ad6   :  { %v4280_v55 = vpack.c.bf16 %v2967_v24, %v2966_v45 }
0x1ad9   :  { %4383 = vrot.lane.b32.xlu0 %v4382_v1, %s4572_s1  ;;  %v2969_v1 = vld [vmem:[#allocation5 + $0x278] sm:$0xff] }
0x1b4b   :  { %v2618_v16 = vpop.xlane.xlu1 %2617 }
0x1b4c   :  { %v2620_v43 = vsub.f32 %v2610_v23, %v2618_v16  ;;  %v2615_v57 = vpop.xlane.xlu0 %2614  ;;  %v4284_v16 = vpack.c.bf16 %v2969_v1, %v2968_v52 }
0x1b4d   :  { %v2619_v39 = vsub.f32 %v2605_v2, %v2615_v57  ;;  %v3059_v57 = vld [vmem:[#allocation5 + $0x290] sm:$0xff] }
0x1b4e   :  { %v2623_v35 = vmul.f32 1.442695, %v2620_v43  ;;  %v3058_v43 = vld [vmem:[#allocation5 + $0x288] sm:$0xff] }
0x1b4f   :  { %v2621_v25 = vmul.f32 1.442695, %v2619_v39  ;;  %v4379_v30 = vpop.permute.xlu1 %4378  ;;  %v3060_v39 = vld [vmem:[#allocation5 + $0x298] sm:$0xff] }
0x1b50   :  { %v4374_v8 = vpop.permute.xlu0 %4373  ;;  %v4381_v12 = vunpack.i.h.bf16 %v4379_v30  ;;  %v4380_v19 = vunpack.i.l.bf16 %v4379_v30 }
0x1b51   :  { %4456 = vpow2.f32 %v2621_v25  ;;  %v4376_v37 = vunpack.i.h.bf16 %v4374_v8  ;;  %v4375_v42 = vunpack.i.l.bf16 %v4374_v8  ;;  %v3061_v25 = vld [vmem:[#allocation5 + $0x2a0] sm:$0xff] }
0x1b52   :  { %4458 = vpow2.f32 %v2623_v35  ;;  %v4260_v36 = vpack.c.bf16 %v4381_v12, %v4380_v19  ;;  %v4288_v35 = vpack.c.bf16 %v3059_v57, %v3058_v43  ;;  %v4292_v8 = vpack.c.bf16 %v3061_v25, %v3060_v39 }
0x1b53   :  { %v4256_v54 = vpack.c.bf16 %v4376_v37, %v4375_v42  ;;  %v4389_v38 = vpop.permute.xlu1 %4388  ;;  %v3062_v37 = vld [vmem:[#allocation5 + $0x2a8] sm:$0xff]  ;;  %v3063_v42 = vld [vmem:[#allocation5 + $0x2b0] sm:$0xff] }
0x1b54   :  { %v4384_v28 = vpop.permute.xlu0 %4383  ;;  %v4391_v46 = vunpack.i.h.bf16 %v4389_v38  ;;  %v4390_v49 = vunpack.i.l.bf16 %v4389_v38  ;;  %4289 = vmatprep.subr.bf16.mxu0 %v4288_v35 }
0x1b55   :  { %4257 = vmatprep.subr.bf16.mxu1 %v4256_v54  ;;  %v4386_v31 = vunpack.i.h.bf16 %v4384_v28  ;;  %v4385_v32 = vunpack.i.l.bf16 %v4384_v28 }
0x1b56   :  { %v4268_v56 = vpack.c.bf16 %v4391_v46, %v4390_v49 }
0x1b57   :  { %v4264_v50 = vpack.c.bf16 %v4386_v31, %v4385_v32 }
0x1b5b   :  { %v4457_v47 = vpop.eup %4456 }
0x1b5c   :  { %v4459_v29 = vpop.eup %4458  ;;  %3889 = vmatprep.mubr.msk.f32.mxu1 %vm294_vm5, %v4457_v47 }
0x1b5d   :  { %3890 = vmatmul.mubr.msk.f32.vlgmr.msra.gmra.mrb[22].mxu1 %vm294_vm5, %v4459_v29 }
0x1b5e   :  { %4259 = vmatpush3.bf16.msra.mxu1 %v4256_v54  ;;  %v4296_v54 = vpack.c.bf16 %v3063_v42, %v3062_v37 }
0x1b5f   :  { %4261 = vmatprep.subr.bf16.mxu1 %v4260_v36 }
0x1b62   :  { %4263 = vmatpush3.bf16.msra.mxu1 %v4260_v36 }
0x1b63   :  { %4265 = vmatprep.subr.bf16.mxu1 %v4264_v50 }
0x1b66   :  { %4267 = vmatpush3.bf16.msra.mxu1 %v4264_v50 }
0x1b67   :  { %4269 = vmatprep.subr.bf16.mxu1 %v4268_v56 }
0x1b6a   :  { %4271 = vmatpush3.bf16.msra.mxu1 %v4268_v56 }
0x1b6b   :  { %4281 = vmatprep.subr.bf16.mxu1 %v4280_v55 }
0x1c30   :  { %v3891_v59 = vpop.f32.mrb[22].mxu1 }
0x1c31   :  { %v2707_v6 = vmax.f32 %v3891_v59, 1e-30  ;;  %v2697_v17 = vpop.f32.mrb[23].mxu1 }
0x1c32   :  { %v2706_v53 = vmax.f32 %v2697_v17, 1e-30 }
0x1c33   :  { %4460 = vrcp.f32 %v2707_v6 }
0x1c34   :  { %4462 = vrcp.f32 %v2706_v53 }
0x1c3d   :  { %v4461_v61 = vpop.eup %4460 }
0x1c3e   :  { %v4463_v22 = vpop.eup %4462  ;;  %v2711_v9 = vmul.f32 %v4461_v61, %v4459_v29 }
0x1c3f   :  { %v2709_v13 = vmul.f32 %v4463_v22, %v4457_v47 }
0x1c41   :  { %3908 = vmatprep.mubr.msk.f32.mxu1 %vm294_vm5, %v2709_v13  ;;  %v3064_v13 = vld [vmem:[#allocation5 + $0x2b8] sm:$0xff] }
0x1c42   :  { %3909 = vmatmul.mubr.msk.f32.vlgmr.msra.gmra.mrb[24].mxu1 %vm294_vm5, %v2711_v9  ;;  %v3065_v9 = vld [vmem:[#allocation5 + $0x2c0] sm:$0xff] }
0x1c43   :  { %4283 = vmatpush3.bf16.msra.mxu1 %v4280_v55 }
0x1c44   :  { %4285 = vmatprep.subr.bf16.mxu1 %v4284_v16 }
0x1c47   :  { %4287 = vmatpush3.bf16.msra.mxu1 %v4284_v16 }
0x1d15   :  { %v3910_v62 = vpop.f32.mrb[24].mxu1 }
0x1d16   :  { %v2816_v48 = vpop.f32.mrb[25].mxu1 }
0x1d17   :  { %3919 = vmatprep.mubr.msk.f32.mxu0 %vm76_vm0, %v2816_v48  ;;  %v3334_v48 = vld [vmem:[#allocation5 + $0x280] ss:$0 sm:$0xff] }
0x1d18   :  { %3920 = vmatmul.mubr.msk.f32.vlgmr.msra.gmra.mrb[20].mxu0 %vm76_vm0, %v3910_v62  ;;  %v4300_v62 = vpack.c.bf16 %v3065_v9, %v3064_v13 }
0x1d19   :  { %4291 = vmatpush3.bf16.msra.mxu0 %v4288_v35 }
0x1d1a   :  { %4293 = vmatprep.subr.bf16.mxu0 %v4292_v8 }
0x1d1d   :  { %4295 = vmatpush3.bf16.msra.mxu0 %v4292_v8 }
0x1d1e   :  { %4297 = vmatprep.subr.bf16.mxu0 %v4296_v54 }
0x1d21   :  { %4299 = vmatpush3.bf16.msra.mxu0 %v4296_v54 }
0x1d22   :  { %4301 = vmatprep.subr.bf16.mxu0 %v4300_v62 }
0x1d25   :  { %4303 = vmatpush3.bf16.msra.mxu0 %v4300_v62 }
0x1deb   :  { %v3921_v11 = vpop.f32.mrb[20].mxu0 }
0x1dec   :  { %v2907_v7 = vadd.f32 %v3921_v11, %v3329_v4  ;;  %v2901_v26 = vpop.f32.mrb[21].mxu0 }
0x1ded   :  { %v2902_v23 = vadd.f32 %v3329_v4, %v2901_v26 }
0x1dee   :  { %v5168_v21 = vadd.f32 %v2907_v7, %v5080_v27 }
0x1def   :  { %v5171_v3 = vadd.f32 %v2902_v23, %v5083_v33 }
0x1df0   :  { %v2917_v2 = vsel %vm76_vm0, %v5168_v21, 0.0 }
0x1df1   :  { %2918 = vadd.xlane.f32.xlu1 %v2917_v2  ;;  %v2914_v5 = vsel %vm76_vm0, %v5171_v3, 0.0 }
0x1df2   :  { %2915 = vadd.xlane.f32.xlu0 %v2914_v5 }
0x1e7e   :  { %v2919_v14 = vpop.xlane.xlu1 %2918 }
0x1e7f   :  { %v2921_v63 = vmul.f32 0.03125, %v2919_v14  ;;  %v2916_v60 = vpop.xlane.xlu0 %2915  ;;  %v3339_v14 = vld [vmem:[#allocation5 + $0x2c8] ss:$0 sm:$0xff] }
0x1e80   :  { %v2920_v40 = vmul.f32 0.03125, %v2916_v60 }
0x1e81   :  { %v2923_v15 = vsub.f32 %v5168_v21, %v2921_v63 }
0x1e82   :  { %v2922_v27 = vsub.f32 %v5171_v3, %v2920_v40 }
0x1e83   :  { %v2925_v20 = vmul.f32 %v2923_v15, %v2923_v15  ;;  %v2953_v6 = vmul.f32 %v3332_v34, %v2923_v15 }
0x1e84   :  { %v2924_v44 = vmul.f32 %v2922_v27, %v2922_v27  ;;  %v2952_v51 = vmul.f32 %v3332_v34, %v2922_v27 }
0x1e85   :  { %v2929_v18 = vsel %vm76_vm0, %v2925_v20, 0.0 }
0x1e86   :  { %v2926_v33 = vsel %vm76_vm0, %v2924_v44, 0.0 }
0x1e87   :  { %2927 = vadd.xlane.f32.xlu0 %v2926_v33 }
0x1e8b   :  { %2930 = vadd.xlane.f32.xlu0 %v2929_v18 }
0x1f14   :  { %v2928_v30 = vpop.xlane.xlu0 %2927 }
0x1f15   :  { %v2932_v12 = vmul.f32 0.032258064, %v2928_v30 }
0x1f17   :  { %4464 = vrsqrt.f32 %v2932_v12  ;;  %vm2936_vm6 = vcmp.eq.f32.partialorder %v2932_v12, inf  ;;  %v2939_v36 = vand.u32 2147483648, %v2932_v12  ;;  %vm2938_vm10 = vcmp.eq.f32.partialorder %v2932_v12, 0.0 }
0x1f18   :  { %v2931_v19 = vpop.xlane.xlu0 %2930 }
0x1f19   :  { %v2933_v28 = vmul.f32 0.032258064, %v2931_v19 }
0x1f1b   :  { %4466 = vrsqrt.f32 %v2933_v28  ;;  %vm2943_vm11 = vcmp.eq.f32.partialorder %v2933_v28, inf  ;;  %v2946_v50 = vand.u32 2147483648, %v2933_v28  ;;  %vm2945_vm12 = vcmp.eq.f32.partialorder %v2933_v28, 0.0 }
0x1f21   :  { %v4465_v47 = vpop.eup %4464 }
0x1f22   :  { %v2935_v29 = vmul.f32 %v4465_v47, %v2932_v12 }
0x1f24   :  { %v2937_v31 = vsel %vm2936_vm6, %v2932_v12, %v2935_v29 }
0x1f25   :  { %v4467_v32 = vpop.eup %4466  ;;  %v2940_v38 = vsel %vm2938_vm10, %v2939_v36, %v2937_v31  ;;  %v3340_v31 = vld [vmem:[#allocation5 + $0x2d0] ss:$0 sm:$0xff] }
0x1f26   :  { %v2942_v46 = vmul.f32 %v4467_v32, %v2933_v28  ;;  %v2954_v49 = vadd.f32 1e-06, %v2940_v38 }
0x1f28   :  { %v2944_v56 = vsel %vm2943_vm11, %v2933_v28, %v2942_v46  ;;  %4468 = vrcp.f32 %v2954_v49  ;;  %v3341_v49 = vld [vmem:[#allocation5 + $0x2d8] ss:$0 sm:$0xff] }
0x1f29   :  { %v2947_v58 = vsel %vm2945_vm12, %v2946_v50, %v2944_v56 }
0x1f2a   :  { %v2955_v41 = vadd.f32 1e-06, %v2947_v58 }
0x1f2c   :  { %4470 = vrcp.f32 %v2955_v41 }
0x1f32   :  { %v4469_v0 = vpop.eup %4468 }
0x1f33   :  { %v2957_v59 = vmul.f32 %v4469_v0, %v2952_v51 }
0x1f35   :  { %v2964_v17 = vadd.f32 %v3333_v10, %v2957_v59 }
0x1f36   :  { %v4471_v53 = vpop.eup %4470 }
0x1f37   :  { %v2959_v61 = vmul.f32 %v4471_v53, %v2953_v6  ;;  %3930 = vmatprep.mubr.msk.f32.mxu1 %vm76_vm0, %v2964_v17 }
0x1f39   :  { %v2965_v22 = vadd.f32 %v3333_v10, %v2959_v61 }
0x1f3b   :  { %3931 = vmatmul.mubr.msk.f32.vlgmr.msra.gmra.mrb[26].mxu1 %vm76_vm0, %v2965_v22 }
0x200e   :  { %v3932_v4 = vpop.f32.mrb[26].mxu1 }
0x200f   :  { %v3053_v11 = vadd.f32 %v3932_v4, %v3334_v48  ;;  %v3047_v7 = vpop.f32.mrb[27].mxu1 }
0x2010   :  { %v3048_v26 = vadd.f32 %v3334_v48, %v3047_v7 }
0x2011   :  { %v3057_v2 = vmax.f32 %v3053_v11, 0.0 }
0x2012   :  { %v3056_v23 = vmax.f32 %v3048_v26, 0.0 }
0x2014   :  { %3949 = vmatprep.mubr.msk.f32.mxu0 %vm294_vm5, %v3056_v23 }
0x2015   :  { %3950 = vmatmul.mubr.msk.f32.vlgmr.msra.gmra.mrb[22].mxu0 %vm294_vm5, %v3057_v2 }
0x20e8   :  { %v3951_v5 = vpop.f32.mrb[22].mxu0 }
0x20e9   :  { %v3148_v63 = vadd.f32 %v3951_v5, %v5168_v21  ;;  %v3138_v60 = vpop.f32.mrb[23].mxu0 }
0x20ea   :  { %v3147_v40 = vadd.f32 %v3138_v60, %v5171_v3 }
0x20eb   :  { %v3155_v15 = vadd.f32 %v3339_v14, %v3148_v63 }
0x20ec   :  { %v3154_v27 = vadd.f32 %v3339_v14, %v3147_v40 }
0x20ed   :  { %v3161_v44 = vsel %vm76_vm0, %v3155_v15, 0.0 }
0x20ee   :  { %3162 = vadd.xlane.f32.xlu1 %v3161_v44  ;;  %v3158_v33 = vsel %vm76_vm0, %v3154_v27, 0.0 }
0x20ef   :  { %3159 = vadd.xlane.f32.xlu0 %v3158_v33 }
0x217b   :  { %v3163_v20 = vpop.xlane.xlu1 %3162 }
0x217c   :  { %v3165_v18 = vmul.f32 0.03125, %v3163_v20  ;;  %v3160_v45 = vpop.xlane.xlu0 %3159 }
0x217d   :  { %v3164_v24 = vmul.f32 0.03125, %v3160_v45 }
0x217e   :  { %v3167_v52 = vsub.f32 %v3155_v15, %v3165_v18 }
0x217f   :  { %v3166_v55 = vsub.f32 %v3154_v27, %v3164_v24 }
0x2180   :  { %v3169_v1 = vmul.f32 %v3167_v52, %v3167_v52  ;;  %v3197_v32 = vmul.f32 %v3340_v31, %v3167_v52 }
0x2181   :  { %v3168_v16 = vmul.f32 %v3166_v55, %v3166_v55  ;;  %v3196_v46 = vmul.f32 %v3340_v31, %v3166_v55 }
0x2182   :  { %v3173_v21 = vsel %vm76_vm0, %v3169_v1, 0.0 }
0x2183   :  { %3174 = vadd.xlane.f32.xlu1 %v3173_v21  ;;  %v3170_v3 = vsel %vm76_vm0, %v3168_v16, 0.0 }
0x2184   :  { %3171 = vadd.xlane.f32.xlu0 %v3170_v3 }
0x2210   :  { %v3175_v43 = vpop.xlane.xlu1 %3174 }
0x2211   :  { %v3177_v57 = vmul.f32 0.032258064, %v3175_v43  ;;  %v3172_v39 = vpop.xlane.xlu0 %3171 }
0x2212   :  { %v3176_v35 = vmul.f32 0.032258064, %v3172_v39 }
0x2213   :  { %4472 = vrsqrt.f32 %v3177_v57  ;;  %vm3187_vm5 = vcmp.eq.f32.partialorder %v3177_v57, inf  ;;  %v3190_v42 = vand.u32 2147483648, %v3177_v57  ;;  %vm3189_vm13 = vcmp.eq.f32.partialorder %v3177_v57, 0.0 }
0x2214   :  { %4474 = vrsqrt.f32 %v3176_v35  ;;  %vm3180_vm14 = vcmp.eq.f32.partialorder %v3176_v35, inf  ;;  %v3183_v12 = vand.u32 2147483648, %v3176_v35  ;;  %vm3182_vm15 = vcmp.eq.f32.partialorder %v3176_v35, 0.0 }
0x221d   :  { %v4473_v25 = vpop.eup %4472 }
0x221e   :  { %v4475_v8 = vpop.eup %4474  ;;  %v3186_v37 = vmul.f32 %v4473_v25, %v3177_v57 }
0x221f   :  { %v3179_v54 = vmul.f32 %v4475_v8, %v3176_v35 }
0x2220   :  { %v3188_v30 = vsel %vm3187_vm5, %v3177_v57, %v3186_v37 }
0x2221   :  { %v3191_v19 = vsel %vm3189_vm13, %v3190_v42, %v3188_v30  ;;  %v3181_v28 = vsel %vm3180_vm14, %v3176_v35, %v3179_v54 }
0x2222   :  { %v3199_v47 = vadd.f32 1e-06, %v3191_v19  ;;  %v3184_v29 = vsel %vm3182_vm15, %v3183_v12, %v3181_v28 }
0x2223   :  { %v3198_v36 = vadd.f32 1e-06, %v3184_v29 }
0x2224   :  { %4476 = vrcp.f32 %v3199_v47 }
0x2225   :  { %4478 = vrcp.f32 %v3198_v36 }
0x222e   :  { %v4477_v38 = vpop.eup %4476 }
0x222f   :  { %v4479_v50 = vpop.eup %4478  ;;  %v3203_v56 = vmul.f32 %v4477_v38, %v3197_v32 }
0x2230   :  { %v3201_v58 = vmul.f32 %v4479_v50, %v3196_v46 }
0x2231   :  { %v3209_v41 = vadd.f32 %v3341_v49, %v3203_v56 }
0x2232   :  { %v3208_v34 = vadd.f32 %v3341_v49, %v3201_v58 }
0x2233   :  { %3211 = vst.msk [vmem:[#allocation7 + $0x8] sm:$0xff] %vm76_vm0, %v3209_v41 }
0x2234   :  { %3210 = vst.msk [vmem:[#allocation7] sm:$0xff] %vm76_vm0, %v3208_v34 }
0x2235   :  { %4551 = shalt.err (!%p4548_p6)
}
0x2236   :  { %s4552_s13 = scalar_lea.hbm %s5210_s2, 256 }
0x2237   :  { %p4553_p7 = scmp.ne.s32.totalorder %s5210_s2, %s4552_s13  ;;  %p4556_p8 = scmp.lt.u32.totalorder %s4552_s13, %s5210_s2 }
0x2239   :  { %p4558_p9 = pnand %p4556_p8, %p4553_p7 }
0x223b   :  { %4561 = shalt.err (!%p4558_p9)
}
0x223c   :  { %3223 = dma.vmem_to_hbm [thread:$0]  %s3218_s9, 256, %s5210_s2, [#allocation4], %s4569_s19, %s4569_s19, %s4570_s20  }
0x223d   :  { %4566 = dma.done.wait [#allocation4], 256  }
0x223e   :  { %4567 = vsyncadd [#allocation4], 4294967040 }
0x223f   :  { %3227 = vsyncpa [#allocation3], 1 }
0x2240   :  { %3228 = vsyncpa [#allocation6], 1 }
0x2241   :  { %3229 = vsyncpa [#allocation4], 1 }

</bundles_post_ra>
